<compile_context>
chip_gen: v6e
topology: v6e:2x2x1
jax: 0.10.0
libtpu: 0.0.40
codegen_flags: <defaults>
</compile_context>

<pallas_src>
import jax
import jax.numpy as jnp
from jax.experimental import pallas as pl

EMB = 32      # embedding dim
HID = 32      # LSTM hidden dim
FC1 = 64      # fc1 out dim


def _lstm_multi_bn_kernel(tok_ref,                      # (Bp, T)   int32
                          emb_ref,                      # (V, EMB)  bf16
                          wih0_ref, whh0_ref, b0_ref,   # (EMB,4H)(H,4H) bf16, (1,4H) f32
                          w1cat_ref, b1_ref,            # (2H,4H) bf16 = [Wih1;Whh1], (1,4H) f32
                          bng_ref, bnb_ref, bnm_ref, bnv_ref,   # (1,H) f32 BN params/stats
                          fc1w_ref, fc1b_ref,           # (H,FC1) bf16, (1,FC1) f32
                          fc2w_ref, fc2b_ref,           # (FC1,V) bf16, (1,V)   f32
                          out_ref):                     # (Bp, V) f32
    Bp, T = tok_ref.shape
    V = emb_ref.shape[0]
    H = HID
    f32 = jnp.float32
    bf16 = jnp.bfloat16

    whh0 = whh0_ref[...]
    w1cat = w1cat_ref[...]
    b1 = b1_ref[...]

    def cell(gates, c_prev):
        # Full-width activations on (Bp, 4H), then slice i/f/g/o (PyTorch order).
        sig = jax.nn.sigmoid(gates)
        th = jnp.tanh(gates)
        i_g = sig[:, 0 * H:1 * H]
        f_g = sig[:, 1 * H:2 * H]
        g_g = th[:, 2 * H:3 * H]
        o_g = sig[:, 3 * H:4 * H]
        c = f_g * c_prev + i_g * g_g
        h = o_g * jnp.tanh(c)
        # bf16 h feeds the next step's matmul (keeps the cast off the chain is
        # impossible, but it replaces a cast at every consumer); f32 h is only
        # consumed at the final timestep (BN input) and is dead-code elsewhere.
        return h.astype(bf16), c, h

    # ---- in-kernel embedding gather via one-hot MXU matmul (off the chain) ----
    tok = tok_ref[...]                                                    # (Bp, T)
    tok_tm = jnp.concatenate([tok[:, t:t + 1] for t in range(T)], axis=0)  # (T*Bp, 1) time-major
    lane_iota = jax.lax.broadcasted_iota(jnp.int32, (T * Bp, V), 1)
    onehot = (tok_tm == lane_iota).astype(bf16)                           # (T*Bp, V)
    x_bf = jnp.dot(onehot, emb_ref[...],
                   preferred_element_type=f32).astype(bf16)               # exact row select
    # layer-0 input projection for ALL timesteps: one batched matmul + folded bias
    xg0 = jnp.dot(x_bf, wih0_ref[...], preferred_element_type=f32) + b0_ref[...]  # (T*Bp, 4H)

    # ---- wavefront over the two LSTM layers -------------------------------
    h0 = jnp.zeros((Bp, H), bf16)   # h0[s-1]
    c0 = jnp.zeros((Bp, H), f32)
    h1 = jnp.zeros((Bp, H), bf16)   # h1[s-2]
    c1 = jnp.zeros((Bp, H), f32)
    h1_f = jnp.zeros((Bp, H), f32)  # final-layer f32 state for BN

    for s in range(T + 1):          # static unroll (T small)
        # layer 0, step s: uses h0[s-1] (current h0)
        if s < T:
            g0 = xg0[s * Bp:(s + 1) * Bp, :]
            if s > 0:
                g0 = g0 + jnp.dot(h0, whh0, preferred_element_type=f32)
            nh0, nc0, _ = cell(g0, c0)
        # layer 1, step s-1: uses h0[s-1] (current h0) and h1[s-2] (current h1)
        # -> independent of layer-0's step-s cell above, so they overlap.
        if s >= 1:
            cat = jnp.concatenate([h0, h1], axis=1)            # (Bp, 2H)
            g1 = jnp.dot(cat, w1cat, preferred_element_type=f32) + b1
            h1, c1, h1_f = cell(g1, c1)
        if s < T:
            h0, c0 = nh0, nc0

    # ---- BatchNorm1d (eval-mode, folded in-kernel) + fc1/relu + fc2 --------
    scale = bng_ref[...] * jax.lax.rsqrt(bnv_ref[...] + 1e-5)
    shift = bnb_ref[...] - bnm_ref[...] * scale
    h_bn = h1_f * scale + shift
    hid = (jnp.dot(h_bn.astype(bf16), fc1w_ref[...], preferred_element_type=f32)
           + fc1b_ref[...])
    hid = jnp.maximum(hid, 0.0)
    # TODO(synk): at realistic vocab sizes (tens of thousands), either tile
    # fc2_w over the vocab axis (last grid axis, recurrence guarded with
    # pl.when(program_id==0) + persistent hid scratch) or give fc2_w
    # memory_space=pl.ANY and overlap its DMA with the recurrence via
    # pltpu.make_async_copy; on v7x add a ("parallel",) batch grid axis so the
    # second TensorCore takes half the batch, and size vocab tiles for 64 MiB VMEM.
    out_ref[...] = (jnp.dot(hid.astype(bf16), fc2w_ref[...], preferred_element_type=f32)
                    + fc2b_ref[...])


def _full_spec(shape):
    # whole array resident in VMEM, no grid tiling
    return pl.BlockSpec(shape, lambda: (0,) * len(shape))


def prepare_params(params):
    """One-time prep (outside the per-call jit): bf16 weight casts, layer-1
    weight concat for the fused (h0,h1) @ [Wih1; Whh1] dot, (1,H) reshapes."""
    bf = lambda a: jnp.asarray(a, jnp.bfloat16)
    f32 = lambda a: jnp.asarray(a, jnp.float32)
    return dict(
        emb=bf(params["embedding"]),
        wih0=bf(params["wih0"]), whh0=bf(params["whh0"]), b0=f32(params["b0"]),
        w1cat=bf(jnp.concatenate([params["wih1"], params["whh1"]], axis=0)),
        b1=f32(params["b1"]),
        bn_gamma=f32(params["bn_gamma"]).reshape(1, HID),
        bn_beta=f32(params["bn_beta"]).reshape(1, HID),
        bn_mean=f32(params["bn_mean"]).reshape(1, HID),
        bn_var=f32(params["bn_var"]).reshape(1, HID),
        fc1_w=bf(params["fc1_w"]), fc1_b=f32(params["fc1_b"]),
        fc2_w=bf(params["fc2_w"]), fc2_b=f32(params["fc2_b"]),
    )


def leonard_lstm_multi_bn_forward(tokens, prep):
    """tokens: (B, T) int32; prep: prepare_params(...). Returns logits (B, n_vocab) f32."""
    B, T = tokens.shape
    n_vocab = prep["fc2_w"].shape[1]
    Bp = ((B + 7) // 8) * 8            # pad batch to a full sublane tile

    tok = tokens.astype(jnp.int32)
    if Bp != B:
        tok = jnp.pad(tok, ((0, Bp - B), (0, 0)))   # pad rows use token 0; sliced off below

    ins = (tok, prep["emb"],
           prep["wih0"], prep["whh0"], prep["b0"],
           prep["w1cat"], prep["b1"],
           prep["bn_gamma"], prep["bn_beta"], prep["bn_mean"], prep["bn_var"],
           prep["fc1_w"], prep["fc1_b"],
           prep["fc2_w"], prep["fc2_b"])

    # Everything (<1 MiB) fits in VMEM -> single gridless invocation.
    logits = pl.pallas_call(
        _lstm_multi_bn_kernel,
        out_shape=jax.ShapeDtypeStruct((Bp, n_vocab), jnp.float32),
        in_specs=[_full_spec(a.shape) for a in ins],
        out_specs=_full_spec((Bp, n_vocab)),
    )(*ins)
    return logits[:B]


def init_params(n_vocab, key):
    """Deterministic synthetic parameters matching the module's shapes (f32)."""
    ks = jax.random.split(key, 16)
    u = lambda k, shape, lo, hi: jax.random.uniform(k, shape, jnp.float32, lo, hi)
    s = 1.0 / (HID ** 0.5)
    sf = 1.0 / (FC1 ** 0.5)
    params = {
        "embedding": jax.random.normal(ks[0], (n_vocab, EMB), jnp.float32),
        # LSTM layer 0 (weights stored transposed: (in, 4H)); bias = b_ih + b_hh
        "wih0": u(ks[1], (EMB, 4 * HID), -s, s),
        "whh0": u(ks[2], (HID, 4 * HID), -s, s),
        "b0":   u(ks[3], (1, 4 * HID), -s, s),
        # LSTM layer 1
        "wih1": u(ks[4], (HID, 4 * HID), -s, s),
        "whh1": u(ks[5], (HID, 4 * HID), -s, s),
        "b1":   u(ks[6], (1, 4 * HID), -s, s),
        # BatchNorm1d(32): affine params + running statistics (eval mode)
        "bn_gamma": u(ks[7], (HID,), 0.5, 1.5),
        "bn_beta":  u(ks[8], (HID,), -0.1, 0.1),
        "bn_mean":  u(ks[9], (HID,), -0.5, 0.5),
        "bn_var":   u(ks[10], (HID,), 0.5, 1.5),
        # fc1: 32 -> 64
        "fc1_w": u(ks[11], (HID, FC1), -s, s),
        "fc1_b": u(ks[12], (1, FC1), -s, s),
        # fc2: 64 -> n_vocab
        "fc2_w": u(ks[13], (FC1, n_vocab), -sf, sf),
        "fc2_b": u(ks[14], (1, n_vocab), -sf, sf),
    }
    return params


if __name__ == "__main__":
    key = jax.random.PRNGKey(0)
    n_vocab = 128
    batch, seq = 2, 8

    pkey, tkey = jax.random.split(key)
    params = init_params(n_vocab, pkey)
    prep = prepare_params(params)          # one-time host prep (casts/concat)
    tokens = jax.random.randint(tkey, (batch, seq), 0, n_vocab, dtype=jnp.int32)

    logits = jax.jit(leonard_lstm_multi_bn_forward)(tokens, prep)
    jax.block_until_ready(logits)
    assert logits.shape == (batch, n_vocab)
    print("KERNEL_OK")
</pallas_src>

<mosaic_0001>
module attributes {stable_mosaic.version = 11 : i64} {
  func.func @_lstm_multi_bn_kernel(%arg0: memref<8x8xi32, #tpu.memory_space<vmem>>, %arg1: memref<128x32xbf16, #tpu.memory_space<vmem>>, %arg2: memref<32x128xbf16, #tpu.memory_space<vmem>>, %arg3: memref<32x128xbf16, #tpu.memory_space<vmem>>, %arg4: memref<1x128xf32, #tpu.memory_space<vmem>>, %arg5: memref<64x128xbf16, #tpu.memory_space<vmem>>, %arg6: memref<1x128xf32, #tpu.memory_space<vmem>>, %arg7: memref<1x32xf32, #tpu.memory_space<vmem>>, %arg8: memref<1x32xf32, #tpu.memory_space<vmem>>, %arg9: memref<1x32xf32, #tpu.memory_space<vmem>>, %arg10: memref<1x32xf32, #tpu.memory_space<vmem>>, %arg11: memref<32x64xbf16, #tpu.memory_space<vmem>>, %arg12: memref<1x64xf32, #tpu.memory_space<vmem>>, %arg13: memref<64x128xbf16, #tpu.memory_space<vmem>>, %arg14: memref<1x128xf32, #tpu.memory_space<vmem>>, %arg15: memref<8x128xf32, #tpu.memory_space<vmem>>) attributes {dimension_semantics = [], scalar_prefetch = 0 : i64, scratch_operands = 0 : i64, tpu.core_type = #tpu.core_type<tc>} {
    %c0 = arith.constant 0 : index
    %c0_0 = arith.constant 0 : index
    %0 = vector.load %arg3[%c0, %c0_0] : memref<32x128xbf16, #tpu.memory_space<vmem>>, vector<32x128xbf16>
    %c0_1 = arith.constant 0 : index
    %c0_2 = arith.constant 0 : index
    %1 = vector.load %arg5[%c0_1, %c0_2] : memref<64x128xbf16, #tpu.memory_space<vmem>>, vector<64x128xbf16>
    %c0_3 = arith.constant 0 : index
    %c0_4 = arith.constant 0 : index
    %2 = vector.load %arg6[%c0_3, %c0_4] : memref<1x128xf32, #tpu.memory_space<vmem>>, vector<1x128xf32>
    %c0_5 = arith.constant 0 : index
    %c0_6 = arith.constant 0 : index
    %3 = vector.load %arg0[%c0_5, %c0_6] : memref<8x8xi32, #tpu.memory_space<vmem>>, vector<8x8xi32>
    %4 = vector.extract_strided_slice %3 {offsets = [0, 0], sizes = [8, 1], strides = [1, 1]} : vector<8x8xi32> to vector<8x1xi32>
    %5 = vector.extract_strided_slice %3 {offsets = [0, 1], sizes = [8, 1], strides = [1, 1]} : vector<8x8xi32> to vector<8x1xi32>
    %6 = vector.extract_strided_slice %3 {offsets = [0, 2], sizes = [8, 1], strides = [1, 1]} : vector<8x8xi32> to vector<8x1xi32>
    %7 = vector.extract_strided_slice %3 {offsets = [0, 3], sizes = [8, 1], strides = [1, 1]} : vector<8x8xi32> to vector<8x1xi32>
    %8 = vector.extract_strided_slice %3 {offsets = [0, 4], sizes = [8, 1], strides = [1, 1]} : vector<8x8xi32> to vector<8x1xi32>
    %9 = vector.extract_strided_slice %3 {offsets = [0, 5], sizes = [8, 1], strides = [1, 1]} : vector<8x8xi32> to vector<8x1xi32>
    %10 = vector.extract_strided_slice %3 {offsets = [0, 6], sizes = [8, 1], strides = [1, 1]} : vector<8x8xi32> to vector<8x1xi32>
    %11 = vector.extract_strided_slice %3 {offsets = [0, 7], sizes = [8, 1], strides = [1, 1]} : vector<8x8xi32> to vector<8x1xi32>
    %12 = tpu.concatenate %4, %5, %6, %7, %8, %9, %10, %11 in 0 : vector<8x1xi32>, vector<8x1xi32>, vector<8x1xi32>, vector<8x1xi32>, vector<8x1xi32>, vector<8x1xi32>, vector<8x1xi32>, vector<8x1xi32> -> vector<64x1xi32>
    %13 = tpu.iota {dimensions = array<i32: 1>} : vector<64x128xi32>
    %14 = vector.broadcast %12 : vector<64x1xi32> to vector<64x128xi32>
    %15 = arith.cmpi eq, %14, %13 : vector<64x128xi32>
    %16 = arith.extui %15 : vector<64x128xi1> to vector<64x128xi32>
    %17 = arith.sitofp %16 : vector<64x128xi32> to vector<64x128xf32>
    %18 = arith.truncf %17 : vector<64x128xf32> to vector<64x128xbf16>
    %c0_7 = arith.constant 0 : index
    %c0_8 = arith.constant 0 : index
    %19 = vector.load %arg1[%c0_7, %c0_8] : memref<128x32xbf16, #tpu.memory_space<vmem>>, vector<128x32xbf16>
    %cst = arith.constant dense<0.000000e+00> : vector<64x32xf32>
    %20 = tpu.matmul %18, %19, %cst {dimension_numbers = #tpu.dot_dimension_numbers<[1], [0], [0], [1], [0, 0, 1, 1], [], []>} : vector<64x128xbf16>, vector<128x32xbf16>, vector<64x32xf32> -> vector<64x32xf32>
    %21 = arith.truncf %20 : vector<64x32xf32> to vector<64x32xbf16>
    %c0_9 = arith.constant 0 : index
    %c0_10 = arith.constant 0 : index
    %22 = vector.load %arg2[%c0_9, %c0_10] : memref<32x128xbf16, #tpu.memory_space<vmem>>, vector<32x128xbf16>
    %cst_11 = arith.constant dense<0.000000e+00> : vector<64x128xf32>
    %23 = tpu.matmul %21, %22, %cst_11 {dimension_numbers = #tpu.dot_dimension_numbers<[1], [0], [0], [1], [0, 0, 1, 1], [], []>} : vector<64x32xbf16>, vector<32x128xbf16>, vector<64x128xf32> -> vector<64x128xf32>
    %c0_12 = arith.constant 0 : index
    %c0_13 = arith.constant 0 : index
    %24 = vector.load %arg4[%c0_12, %c0_13] : memref<1x128xf32, #tpu.memory_space<vmem>>, vector<1x128xf32>
    %25 = vector.broadcast %24 : vector<1x128xf32> to vector<64x128xf32>
    %26 = arith.addf %23, %25 : vector<64x128xf32>
    %cst_14 = arith.constant 0.000000e+00 : f32
    %27 = vector.broadcast %cst_14 : f32 to vector<8x32xf32>
    %cst_15 = arith.constant 0.000000e+00 : bf16
    %28 = vector.broadcast %cst_15 : bf16 to vector<8x32xbf16>
    %cst_16 = arith.constant 0.000000e+00 : f32
    %29 = vector.broadcast %cst_16 : f32 to vector<8x32xf32>
    %30 = vector.extract_strided_slice %26 {offsets = [0, 0], sizes = [8, 128], strides = [1, 1]} : vector<64x128xf32> to vector<8x128xf32>
    %31 = arith.negf %30 : vector<8x128xf32>
    %32 = math.exp %31 : vector<8x128xf32>
    %cst_17 = arith.constant 1.000000e+00 : f32
    %33 = vector.broadcast %cst_17 : f32 to vector<8x128xf32>
    %34 = arith.addf %33, %32 : vector<8x128xf32>
    %35 = arith.divf %33, %34 : vector<8x128xf32>
    %36 = math.tanh %30 : vector<8x128xf32>
    %37 = vector.extract_strided_slice %35 {offsets = [0, 0], sizes = [8, 32], strides = [1, 1]} : vector<8x128xf32> to vector<8x32xf32>
    %38 = vector.extract_strided_slice %35 {offsets = [0, 32], sizes = [8, 32], strides = [1, 1]} : vector<8x128xf32> to vector<8x32xf32>
    %39 = vector.extract_strided_slice %36 {offsets = [0, 64], sizes = [8, 32], strides = [1, 1]} : vector<8x128xf32> to vector<8x32xf32>
    %40 = vector.extract_strided_slice %35 {offsets = [0, 96], sizes = [8, 32], strides = [1, 1]} : vector<8x128xf32> to vector<8x32xf32>
    %41 = arith.mulf %38, %27 : vector<8x32xf32>
    %42 = arith.mulf %37, %39 : vector<8x32xf32>
    %43 = arith.addf %41, %42 : vector<8x32xf32>
    %44 = math.tanh %43 : vector<8x32xf32>
    %45 = arith.mulf %40, %44 : vector<8x32xf32>
    %46 = arith.truncf %45 : vector<8x32xf32> to vector<8x32xbf16>
    %47 = vector.extract_strided_slice %26 {offsets = [8, 0], sizes = [8, 128], strides = [1, 1]} : vector<64x128xf32> to vector<8x128xf32>
    %cst_18 = arith.constant dense<0.000000e+00> : vector<8x128xf32>
    %48 = tpu.matmul %46, %0, %cst_18 {dimension_numbers = #tpu.dot_dimension_numbers<[1], [0], [0], [1], [0, 0, 1, 1], [], []>} : vector<8x32xbf16>, vector<32x128xbf16>, vector<8x128xf32> -> vector<8x128xf32>
    %49 = arith.addf %47, %48 : vector<8x128xf32>
    %50 = arith.negf %49 : vector<8x128xf32>
    %51 = math.exp %50 : vector<8x128xf32>
    %cst_19 = arith.constant 1.000000e+00 : f32
    %52 = vector.broadcast %cst_19 : f32 to vector<8x128xf32>
    %53 = arith.addf %52, %51 : vector<8x128xf32>
    %54 = arith.divf %52, %53 : vector<8x128xf32>
    %55 = math.tanh %49 : vector<8x128xf32>
    %56 = vector.extract_strided_slice %54 {offsets = [0, 0], sizes = [8, 32], strides = [1, 1]} : vector<8x128xf32> to vector<8x32xf32>
    %57 = vector.extract_strided_slice %54 {offsets = [0, 32], sizes = [8, 32], strides = [1, 1]} : vector<8x128xf32> to vector<8x32xf32>
    %58 = vector.extract_strided_slice %55 {offsets = [0, 64], sizes = [8, 32], strides = [1, 1]} : vector<8x128xf32> to vector<8x32xf32>
    %59 = vector.extract_strided_slice %54 {offsets = [0, 96], sizes = [8, 32], strides = [1, 1]} : vector<8x128xf32> to vector<8x32xf32>
    %60 = arith.mulf %57, %43 : vector<8x32xf32>
    %61 = arith.mulf %56, %58 : vector<8x32xf32>
    %62 = arith.addf %60, %61 : vector<8x32xf32>
    %63 = math.tanh %62 : vector<8x32xf32>
    %64 = arith.mulf %59, %63 : vector<8x32xf32>
    %65 = arith.truncf %64 : vector<8x32xf32> to vector<8x32xbf16>
    %66 = tpu.concatenate %46, %28 in 1 : vector<8x32xbf16>, vector<8x32xbf16> -> vector<8x64xbf16>
    %cst_20 = arith.constant dense<0.000000e+00> : vector<8x128xf32>
    %67 = tpu.matmul %66, %1, %cst_20 {dimension_numbers = #tpu.dot_dimension_numbers<[1], [0], [0], [1], [0, 0, 1, 1], [], []>} : vector<8x64xbf16>, vector<64x128xbf16>, vector<8x128xf32> -> vector<8x128xf32>
    %68 = vector.broadcast %2 : vector<1x128xf32> to vector<8x128xf32>
    %69 = arith.addf %67, %68 : vector<8x128xf32>
    %70 = arith.negf %69 : vector<8x128xf32>
    %71 = math.exp %70 : vector<8x128xf32>
    %cst_21 = arith.constant 1.000000e+00 : f32
    %72 = vector.broadcast %cst_21 : f32 to vector<8x128xf32>
    %73 = arith.addf %72, %71 : vector<8x128xf32>
    %74 = arith.divf %72, %73 : vector<8x128xf32>
    %75 = math.tanh %69 : vector<8x128xf32>
    %76 = vector.extract_strided_slice %74 {offsets = [0, 0], sizes = [8, 32], strides = [1, 1]} : vector<8x128xf32> to vector<8x32xf32>
    %77 = vector.extract_strided_slice %74 {offsets = [0, 32], sizes = [8, 32], strides = [1, 1]} : vector<8x128xf32> to vector<8x32xf32>
    %78 = vector.extract_strided_slice %75 {offsets = [0, 64], sizes = [8, 32], strides = [1, 1]} : vector<8x128xf32> to vector<8x32xf32>
    %79 = vector.extract_strided_slice %74 {offsets = [0, 96], sizes = [8, 32], strides = [1, 1]} : vector<8x128xf32> to vector<8x32xf32>
    %80 = arith.mulf %77, %29 : vector<8x32xf32>
    %81 = arith.mulf %76, %78 : vector<8x32xf32>
    %82 = arith.addf %80, %81 : vector<8x32xf32>
    %83 = math.tanh %82 : vector<8x32xf32>
    %84 = arith.mulf %79, %83 : vector<8x32xf32>
    %85 = arith.truncf %84 : vector<8x32xf32> to vector<8x32xbf16>
    %86 = vector.extract_strided_slice %26 {offsets = [16, 0], sizes = [8, 128], strides = [1, 1]} : vector<64x128xf32> to vector<8x128xf32>
    %cst_22 = arith.constant dense<0.000000e+00> : vector<8x128xf32>
    %87 = tpu.matmul %65, %0, %cst_22 {dimension_numbers = #tpu.dot_dimension_numbers<[1], [0], [0], [1], [0, 0, 1, 1], [], []>} : vector<8x32xbf16>, vector<32x128xbf16>, vector<8x128xf32> -> vector<8x128xf32>
    %88 = arith.addf %86, %87 : vector<8x128xf32>
    %89 = arith.negf %88 : vector<8x128xf32>
    %90 = math.exp %89 : vector<8x128xf32>
    %cst_23 = arith.constant 1.000000e+00 : f32
    %91 = vector.broadcast %cst_23 : f32 to vector<8x128xf32>
    %92 = arith.addf %91, %90 : vector<8x128xf32>
    %93 = arith.divf %91, %92 : vector<8x128xf32>
    %94 = math.tanh %88 : vector<8x128xf32>
    %95 = vector.extract_strided_slice %93 {offsets = [0, 0], sizes = [8, 32], strides = [1, 1]} : vector<8x128xf32> to vector<8x32xf32>
    %96 = vector.extract_strided_slice %93 {offsets = [0, 32], sizes = [8, 32], strides = [1, 1]} : vector<8x128xf32> to vector<8x32xf32>
    %97 = vector.extract_strided_slice %94 {offsets = [0, 64], sizes = [8, 32], strides = [1, 1]} : vector<8x128xf32> to vector<8x32xf32>
    %98 = vector.extract_strided_slice %93 {offsets = [0, 96], sizes = [8, 32], strides = [1, 1]} : vector<8x128xf32> to vector<8x32xf32>
    %99 = arith.mulf %96, %62 : vector<8x32xf32>
    %100 = arith.mulf %95, %97 : vector<8x32xf32>
    %101 = arith.addf %99, %100 : vector<8x32xf32>
    %102 = math.tanh %101 : vector<8x32xf32>
    %103 = arith.mulf %98, %102 : vector<8x32xf32>
    %104 = arith.truncf %103 : vector<8x32xf32> to vector<8x32xbf16>
    %105 = tpu.concatenate %65, %85 in 1 : vector<8x32xbf16>, vector<8x32xbf16> -> vector<8x64xbf16>
    %cst_24 = arith.constant dense<0.000000e+00> : vector<8x128xf32>
    %106 = tpu.matmul %105, %1, %cst_24 {dimension_numbers = #tpu.dot_dimension_numbers<[1], [0], [0], [1], [0, 0, 1, 1], [], []>} : vector<8x64xbf16>, vector<64x128xbf16>, vector<8x128xf32> -> vector<8x128xf32>
    %107 = vector.broadcast %2 : vector<1x128xf32> to vector<8x128xf32>
    %108 = arith.addf %106, %107 : vector<8x128xf32>
    %109 = arith.negf %108 : vector<8x128xf32>
    %110 = math.exp %109 : vector<8x128xf32>
    %cst_25 = arith.constant 1.000000e+00 : f32
    %111 = vector.broadcast %cst_25 : f32 to vector<8x128xf32>
    %112 = arith.addf %111, %110 : vector<8x128xf32>
    %113 = arith.divf %111, %112 : vector<8x128xf32>
    %114 = math.tanh %108 : vector<8x128xf32>
    %115 = vector.extract_strided_slice %113 {offsets = [0, 0], sizes = [8, 32], strides = [1, 1]} : vector<8x128xf32> to vector<8x32xf32>
    %116 = vector.extract_strided_slice %113 {offsets = [0, 32], sizes = [8, 32], strides = [1, 1]} : vector<8x128xf32> to vector<8x32xf32>
    %117 = vector.extract_strided_slice %114 {offsets = [0, 64], sizes = [8, 32], strides = [1, 1]} : vector<8x128xf32> to vector<8x32xf32>
    %118 = vector.extract_strided_slice %113 {offsets = [0, 96], sizes = [8, 32], strides = [1, 1]} : vector<8x128xf32> to vector<8x32xf32>
    %119 = arith.mulf %116, %82 : vector<8x32xf32>
    %120 = arith.mulf %115, %117 : vector<8x32xf32>
    %121 = arith.addf %119, %120 : vector<8x32xf32>
    %122 = math.tanh %121 : vector<8x32xf32>
    %123 = arith.mulf %118, %122 : vector<8x32xf32>
    %124 = arith.truncf %123 : vector<8x32xf32> to vector<8x32xbf16>
    %125 = vector.extract_strided_slice %26 {offsets = [24, 0], sizes = [8, 128], strides = [1, 1]} : vector<64x128xf32> to vector<8x128xf32>
    %cst_26 = arith.constant dense<0.000000e+00> : vector<8x128xf32>
    %126 = tpu.matmul %104, %0, %cst_26 {dimension_numbers = #tpu.dot_dimension_numbers<[1], [0], [0], [1], [0, 0, 1, 1], [], []>} : vector<8x32xbf16>, vector<32x128xbf16>, vector<8x128xf32> -> vector<8x128xf32>
    %127 = arith.addf %125, %126 : vector<8x128xf32>
    %128 = arith.negf %127 : vector<8x128xf32>
    %129 = math.exp %128 : vector<8x128xf32>
    %cst_27 = arith.constant 1.000000e+00 : f32
    %130 = vector.broadcast %cst_27 : f32 to vector<8x128xf32>
    %131 = arith.addf %130, %129 : vector<8x128xf32>
    %132 = arith.divf %130, %131 : vector<8x128xf32>
    %133 = math.tanh %127 : vector<8x128xf32>
    %134 = vector.extract_strided_slice %132 {offsets = [0, 0], sizes = [8, 32], strides = [1, 1]} : vector<8x128xf32> to vector<8x32xf32>
    %135 = vector.extract_strided_slice %132 {offsets = [0, 32], sizes = [8, 32], strides = [1, 1]} : vector<8x128xf32> to vector<8x32xf32>
    %136 = vector.extract_strided_slice %133 {offsets = [0, 64], sizes = [8, 32], strides = [1, 1]} : vector<8x128xf32> to vector<8x32xf32>
    %137 = vector.extract_strided_slice %132 {offsets = [0, 96], sizes = [8, 32], strides = [1, 1]} : vector<8x128xf32> to vector<8x32xf32>
    %138 = arith.mulf %135, %101 : vector<8x32xf32>
    %139 = arith.mulf %134, %136 : vector<8x32xf32>
    %140 = arith.addf %138, %139 : vector<8x32xf32>
    %141 = math.tanh %140 : vector<8x32xf32>
    %142 = arith.mulf %137, %141 : vector<8x32xf32>
    %143 = arith.truncf %142 : vector<8x32xf32> to vector<8x32xbf16>
    %144 = tpu.concatenate %104, %124 in 1 : vector<8x32xbf16>, vector<8x32xbf16> -> vector<8x64xbf16>
    %cst_28 = arith.constant dense<0.000000e+00> : vector<8x128xf32>
    %145 = tpu.matmul %144, %1, %cst_28 {dimension_numbers = #tpu.dot_dimension_numbers<[1], [0], [0], [1], [0, 0, 1, 1], [], []>} : vector<8x64xbf16>, vector<64x128xbf16>, vector<8x128xf32> -> vector<8x128xf32>
    %146 = vector.broadcast %2 : vector<1x128xf32> to vector<8x128xf32>
    %147 = arith.addf %145, %146 : vector<8x128xf32>
    %148 = arith.negf %147 : vector<8x128xf32>
    %149 = math.exp %148 : vector<8x128xf32>
    %cst_29 = arith.constant 1.000000e+00 : f32
    %150 = vector.broadcast %cst_29 : f32 to vector<8x128xf32>
    %151 = arith.addf %150, %149 : vector<8x128xf32>
    %152 = arith.divf %150, %151 : vector<8x128xf32>
    %153 = math.tanh %147 : vector<8x128xf32>
    %154 = vector.extract_strided_slice %152 {offsets = [0, 0], sizes = [8, 32], strides = [1, 1]} : vector<8x128xf32> to vector<8x32xf32>
    %155 = vector.extract_strided_slice %152 {offsets = [0, 32], sizes = [8, 32], strides = [1, 1]} : vector<8x128xf32> to vector<8x32xf32>
    %156 = vector.extract_strided_slice %153 {offsets = [0, 64], sizes = [8, 32], strides = [1, 1]} : vector<8x128xf32> to vector<8x32xf32>
    %157 = vector.extract_strided_slice %152 {offsets = [0, 96], sizes = [8, 32], strides = [1, 1]} : vector<8x128xf32> to vector<8x32xf32>
    %158 = arith.mulf %155, %121 : vector<8x32xf32>
    %159 = arith.mulf %154, %156 : vector<8x32xf32>
    %160 = arith.addf %158, %159 : vector<8x32xf32>
    %161 = math.tanh %160 : vector<8x32xf32>
    %162 = arith.mulf %157, %161 : vector<8x32xf32>
    %163 = arith.truncf %162 : vector<8x32xf32> to vector<8x32xbf16>
    %164 = vector.extract_strided_slice %26 {offsets = [32, 0], sizes = [8, 128], strides = [1, 1]} : vector<64x128xf32> to vector<8x128xf32>
    %cst_30 = arith.constant dense<0.000000e+00> : vector<8x128xf32>
    %165 = tpu.matmul %143, %0, %cst_30 {dimension_numbers = #tpu.dot_dimension_numbers<[1], [0], [0], [1], [0, 0, 1, 1], [], []>} : vector<8x32xbf16>, vector<32x128xbf16>, vector<8x128xf32> -> vector<8x128xf32>
    %166 = arith.addf %164, %165 : vector<8x128xf32>
    %167 = arith.negf %166 : vector<8x128xf32>
    %168 = math.exp %167 : vector<8x128xf32>
    %cst_31 = arith.constant 1.000000e+00 : f32
    %169 = vector.broadcast %cst_31 : f32 to vector<8x128xf32>
    %170 = arith.addf %169, %168 : vector<8x128xf32>
    %171 = arith.divf %169, %170 : vector<8x128xf32>
    %172 = math.tanh %166 : vector<8x128xf32>
    %173 = vector.extract_strided_slice %171 {offsets = [0, 0], sizes = [8, 32], strides = [1, 1]} : vector<8x128xf32> to vector<8x32xf32>
    %174 = vector.extract_strided_slice %171 {offsets = [0, 32], sizes = [8, 32], strides = [1, 1]} : vector<8x128xf32> to vector<8x32xf32>
    %175 = vector.extract_strided_slice %172 {offsets = [0, 64], sizes = [8, 32], strides = [1, 1]} : vector<8x128xf32> to vector<8x32xf32>
    %176 = vector.extract_strided_slice %171 {offsets = [0, 96], sizes = [8, 32], strides = [1, 1]} : vector<8x128xf32> to vector<8x32xf32>
    %177 = arith.mulf %174, %140 : vector<8x32xf32>
    %178 = arith.mulf %173, %175 : vector<8x32xf32>
    %179 = arith.addf %177, %178 : vector<8x32xf32>
    %180 = math.tanh %179 : vector<8x32xf32>
    %181 = arith.mulf %176, %180 : vector<8x32xf32>
    %182 = arith.truncf %181 : vector<8x32xf32> to vector<8x32xbf16>
    %183 = tpu.concatenate %143, %163 in 1 : vector<8x32xbf16>, vector<8x32xbf16> -> vector<8x64xbf16>
    %cst_32 = arith.constant dense<0.000000e+00> : vector<8x128xf32>
    %184 = tpu.matmul %183, %1, %cst_32 {dimension_numbers = #tpu.dot_dimension_numbers<[1], [0], [0], [1], [0, 0, 1, 1], [], []>} : vector<8x64xbf16>, vector<64x128xbf16>, vector<8x128xf32> -> vector<8x128xf32>
    %185 = vector.broadcast %2 : vector<1x128xf32> to vector<8x128xf32>
    %186 = arith.addf %184, %185 : vector<8x128xf32>
    %187 = arith.negf %186 : vector<8x128xf32>
    %188 = math.exp %187 : vector<8x128xf32>
    %cst_33 = arith.constant 1.000000e+00 : f32
    %189 = vector.broadcast %cst_33 : f32 to vector<8x128xf32>
    %190 = arith.addf %189, %188 : vector<8x128xf32>
    %191 = arith.divf %189, %190 : vector<8x128xf32>
    %192 = math.tanh %186 : vector<8x128xf32>
    %193 = vector.extract_strided_slice %191 {offsets = [0, 0], sizes = [8, 32], strides = [1, 1]} : vector<8x128xf32> to vector<8x32xf32>
    %194 = vector.extract_strided_slice %191 {offsets = [0, 32], sizes = [8, 32], strides = [1, 1]} : vector<8x128xf32> to vector<8x32xf32>
    %195 = vector.extract_strided_slice %192 {offsets = [0, 64], sizes = [8, 32], strides = [1, 1]} : vector<8x128xf32> to vector<8x32xf32>
    %196 = vector.extract_strided_slice %191 {offsets = [0, 96], sizes = [8, 32], strides = [1, 1]} : vector<8x128xf32> to vector<8x32xf32>
    %197 = arith.mulf %194, %160 : vector<8x32xf32>
    %198 = arith.mulf %193, %195 : vector<8x32xf32>
    %199 = arith.addf %197, %198 : vector<8x32xf32>
    %200 = math.tanh %199 : vector<8x32xf32>
    %201 = arith.mulf %196, %200 : vector<8x32xf32>
    %202 = arith.truncf %201 : vector<8x32xf32> to vector<8x32xbf16>
    %203 = vector.extract_strided_slice %26 {offsets = [40, 0], sizes = [8, 128], strides = [1, 1]} : vector<64x128xf32> to vector<8x128xf32>
    %cst_34 = arith.constant dense<0.000000e+00> : vector<8x128xf32>
    %204 = tpu.matmul %182, %0, %cst_34 {dimension_numbers = #tpu.dot_dimension_numbers<[1], [0], [0], [1], [0, 0, 1, 1], [], []>} : vector<8x32xbf16>, vector<32x128xbf16>, vector<8x128xf32> -> vector<8x128xf32>
    %205 = arith.addf %203, %204 : vector<8x128xf32>
    %206 = arith.negf %205 : vector<8x128xf32>
    %207 = math.exp %206 : vector<8x128xf32>
    %cst_35 = arith.constant 1.000000e+00 : f32
    %208 = vector.broadcast %cst_35 : f32 to vector<8x128xf32>
    %209 = arith.addf %208, %207 : vector<8x128xf32>
    %210 = arith.divf %208, %209 : vector<8x128xf32>
    %211 = math.tanh %205 : vector<8x128xf32>
    %212 = vector.extract_strided_slice %210 {offsets = [0, 0], sizes = [8, 32], strides = [1, 1]} : vector<8x128xf32> to vector<8x32xf32>
    %213 = vector.extract_strided_slice %210 {offsets = [0, 32], sizes = [8, 32], strides = [1, 1]} : vector<8x128xf32> to vector<8x32xf32>
    %214 = vector.extract_strided_slice %211 {offsets = [0, 64], sizes = [8, 32], strides = [1, 1]} : vector<8x128xf32> to vector<8x32xf32>
    %215 = vector.extract_strided_slice %210 {offsets = [0, 96], sizes = [8, 32], strides = [1, 1]} : vector<8x128xf32> to vector<8x32xf32>
    %216 = arith.mulf %213, %179 : vector<8x32xf32>
    %217 = arith.mulf %212, %214 : vector<8x32xf32>
    %218 = arith.addf %216, %217 : vector<8x32xf32>
    %219 = math.tanh %218 : vector<8x32xf32>
    %220 = arith.mulf %215, %219 : vector<8x32xf32>
    %221 = arith.truncf %220 : vector<8x32xf32> to vector<8x32xbf16>
    %222 = tpu.concatenate %182, %202 in 1 : vector<8x32xbf16>, vector<8x32xbf16> -> vector<8x64xbf16>
    %cst_36 = arith.constant dense<0.000000e+00> : vector<8x128xf32>
    %223 = tpu.matmul %222, %1, %cst_36 {dimension_numbers = #tpu.dot_dimension_numbers<[1], [0], [0], [1], [0, 0, 1, 1], [], []>} : vector<8x64xbf16>, vector<64x128xbf16>, vector<8x128xf32> -> vector<8x128xf32>
    %224 = vector.broadcast %2 : vector<1x128xf32> to vector<8x128xf32>
    %225 = arith.addf %223, %224 : vector<8x128xf32>
    %226 = arith.negf %225 : vector<8x128xf32>
    %227 = math.exp %226 : vector<8x128xf32>
    %cst_37 = arith.constant 1.000000e+00 : f32
    %228 = vector.broadcast %cst_37 : f32 to vector<8x128xf32>
    %229 = arith.addf %228, %227 : vector<8x128xf32>
    %230 = arith.divf %228, %229 : vector<8x128xf32>
    %231 = math.tanh %225 : vector<8x128xf32>
    %232 = vector.extract_strided_slice %230 {offsets = [0, 0], sizes = [8, 32], strides = [1, 1]} : vector<8x128xf32> to vector<8x32xf32>
    %233 = vector.extract_strided_slice %230 {offsets = [0, 32], sizes = [8, 32], strides = [1, 1]} : vector<8x128xf32> to vector<8x32xf32>
    %234 = vector.extract_strided_slice %231 {offsets = [0, 64], sizes = [8, 32], strides = [1, 1]} : vector<8x128xf32> to vector<8x32xf32>
    %235 = vector.extract_strided_slice %230 {offsets = [0, 96], sizes = [8, 32], strides = [1, 1]} : vector<8x128xf32> to vector<8x32xf32>
    %236 = arith.mulf %233, %199 : vector<8x32xf32>
    %237 = arith.mulf %232, %234 : vector<8x32xf32>
    %238 = arith.addf %236, %237 : vector<8x32xf32>
    %239 = math.tanh %238 : vector<8x32xf32>
    %240 = arith.mulf %235, %239 : vector<8x32xf32>
    %241 = arith.truncf %240 : vector<8x32xf32> to vector<8x32xbf16>
    %242 = vector.extract_strided_slice %26 {offsets = [48, 0], sizes = [8, 128], strides = [1, 1]} : vector<64x128xf32> to vector<8x128xf32>
    %cst_38 = arith.constant dense<0.000000e+00> : vector<8x128xf32>
    %243 = tpu.matmul %221, %0, %cst_38 {dimension_numbers = #tpu.dot_dimension_numbers<[1], [0], [0], [1], [0, 0, 1, 1], [], []>} : vector<8x32xbf16>, vector<32x128xbf16>, vector<8x128xf32> -> vector<8x128xf32>
    %244 = arith.addf %242, %243 : vector<8x128xf32>
    %245 = arith.negf %244 : vector<8x128xf32>
    %246 = math.exp %245 : vector<8x128xf32>
    %cst_39 = arith.constant 1.000000e+00 : f32
    %247 = vector.broadcast %cst_39 : f32 to vector<8x128xf32>
    %248 = arith.addf %247, %246 : vector<8x128xf32>
    %249 = arith.divf %247, %248 : vector<8x128xf32>
    %250 = math.tanh %244 : vector<8x128xf32>
    %251 = vector.extract_strided_slice %249 {offsets = [0, 0], sizes = [8, 32], strides = [1, 1]} : vector<8x128xf32> to vector<8x32xf32>
    %252 = vector.extract_strided_slice %249 {offsets = [0, 32], sizes = [8, 32], strides = [1, 1]} : vector<8x128xf32> to vector<8x32xf32>
    %253 = vector.extract_strided_slice %250 {offsets = [0, 64], sizes = [8, 32], strides = [1, 1]} : vector<8x128xf32> to vector<8x32xf32>
    %254 = vector.extract_strided_slice %249 {offsets = [0, 96], sizes = [8, 32], strides = [1, 1]} : vector<8x128xf32> to vector<8x32xf32>
    %255 = arith.mulf %252, %218 : vector<8x32xf32>
    %256 = arith.mulf %251, %253 : vector<8x32xf32>
    %257 = arith.addf %255, %256 : vector<8x32xf32>
    %258 = math.tanh %257 : vector<8x32xf32>
    %259 = arith.mulf %254, %258 : vector<8x32xf32>
    %260 = arith.truncf %259 : vector<8x32xf32> to vector<8x32xbf16>
    %261 = tpu.concatenate %221, %241 in 1 : vector<8x32xbf16>, vector<8x32xbf16> -> vector<8x64xbf16>
    %cst_40 = arith.constant dense<0.000000e+00> : vector<8x128xf32>
    %262 = tpu.matmul %261, %1, %cst_40 {dimension_numbers = #tpu.dot_dimension_numbers<[1], [0], [0], [1], [0, 0, 1, 1], [], []>} : vector<8x64xbf16>, vector<64x128xbf16>, vector<8x128xf32> -> vector<8x128xf32>
    %263 = vector.broadcast %2 : vector<1x128xf32> to vector<8x128xf32>
    %264 = arith.addf %262, %263 : vector<8x128xf32>
    %265 = arith.negf %264 : vector<8x128xf32>
    %266 = math.exp %265 : vector<8x128xf32>
    %cst_41 = arith.constant 1.000000e+00 : f32
    %267 = vector.broadcast %cst_41 : f32 to vector<8x128xf32>
    %268 = arith.addf %267, %266 : vector<8x128xf32>
    %269 = arith.divf %267, %268 : vector<8x128xf32>
    %270 = math.tanh %264 : vector<8x128xf32>
    %271 = vector.extract_strided_slice %269 {offsets = [0, 0], sizes = [8, 32], strides = [1, 1]} : vector<8x128xf32> to vector<8x32xf32>
    %272 = vector.extract_strided_slice %269 {offsets = [0, 32], sizes = [8, 32], strides = [1, 1]} : vector<8x128xf32> to vector<8x32xf32>
    %273 = vector.extract_strided_slice %270 {offsets = [0, 64], sizes = [8, 32], strides = [1, 1]} : vector<8x128xf32> to vector<8x32xf32>
    %274 = vector.extract_strided_slice %269 {offsets = [0, 96], sizes = [8, 32], strides = [1, 1]} : vector<8x128xf32> to vector<8x32xf32>
    %275 = arith.mulf %272, %238 : vector<8x32xf32>
    %276 = arith.mulf %271, %273 : vector<8x32xf32>
    %277 = arith.addf %275, %276 : vector<8x32xf32>
    %278 = math.tanh %277 : vector<8x32xf32>
    %279 = arith.mulf %274, %278 : vector<8x32xf32>
    %280 = arith.truncf %279 : vector<8x32xf32> to vector<8x32xbf16>
    %281 = vector.extract_strided_slice %26 {offsets = [56, 0], sizes = [8, 128], strides = [1, 1]} : vector<64x128xf32> to vector<8x128xf32>
    %cst_42 = arith.constant dense<0.000000e+00> : vector<8x128xf32>
    %282 = tpu.matmul %260, %0, %cst_42 {dimension_numbers = #tpu.dot_dimension_numbers<[1], [0], [0], [1], [0, 0, 1, 1], [], []>} : vector<8x32xbf16>, vector<32x128xbf16>, vector<8x128xf32> -> vector<8x128xf32>
    %283 = arith.addf %281, %282 : vector<8x128xf32>
    %284 = arith.negf %283 : vector<8x128xf32>
    %285 = math.exp %284 : vector<8x128xf32>
    %cst_43 = arith.constant 1.000000e+00 : f32
    %286 = vector.broadcast %cst_43 : f32 to vector<8x128xf32>
    %287 = arith.addf %286, %285 : vector<8x128xf32>
    %288 = arith.divf %286, %287 : vector<8x128xf32>
    %289 = math.tanh %283 : vector<8x128xf32>
    %290 = vector.extract_strided_slice %288 {offsets = [0, 0], sizes = [8, 32], strides = [1, 1]} : vector<8x128xf32> to vector<8x32xf32>
    %291 = vector.extract_strided_slice %288 {offsets = [0, 32], sizes = [8, 32], strides = [1, 1]} : vector<8x128xf32> to vector<8x32xf32>
    %292 = vector.extract_strided_slice %289 {offsets = [0, 64], sizes = [8, 32], strides = [1, 1]} : vector<8x128xf32> to vector<8x32xf32>
    %293 = vector.extract_strided_slice %288 {offsets = [0, 96], sizes = [8, 32], strides = [1, 1]} : vector<8x128xf32> to vector<8x32xf32>
    %294 = arith.mulf %291, %257 : vector<8x32xf32>
    %295 = arith.mulf %290, %292 : vector<8x32xf32>
    %296 = arith.addf %294, %295 : vector<8x32xf32>
    %297 = math.tanh %296 : vector<8x32xf32>
    %298 = arith.mulf %293, %297 : vector<8x32xf32>
    %299 = arith.truncf %298 : vector<8x32xf32> to vector<8x32xbf16>
    %300 = tpu.concatenate %260, %280 in 1 : vector<8x32xbf16>, vector<8x32xbf16> -> vector<8x64xbf16>
    %cst_44 = arith.constant dense<0.000000e+00> : vector<8x128xf32>
    %301 = tpu.matmul %300, %1, %cst_44 {dimension_numbers = #tpu.dot_dimension_numbers<[1], [0], [0], [1], [0, 0, 1, 1], [], []>} : vector<8x64xbf16>, vector<64x128xbf16>, vector<8x128xf32> -> vector<8x128xf32>
    %302 = vector.broadcast %2 : vector<1x128xf32> to vector<8x128xf32>
    %303 = arith.addf %301, %302 : vector<8x128xf32>
    %304 = arith.negf %303 : vector<8x128xf32>
    %305 = math.exp %304 : vector<8x128xf32>
    %cst_45 = arith.constant 1.000000e+00 : f32
    %306 = vector.broadcast %cst_45 : f32 to vector<8x128xf32>
    %307 = arith.addf %306, %305 : vector<8x128xf32>
    %308 = arith.divf %306, %307 : vector<8x128xf32>
    %309 = math.tanh %303 : vector<8x128xf32>
    %310 = vector.extract_strided_slice %308 {offsets = [0, 0], sizes = [8, 32], strides = [1, 1]} : vector<8x128xf32> to vector<8x32xf32>
    %311 = vector.extract_strided_slice %308 {offsets = [0, 32], sizes = [8, 32], strides = [1, 1]} : vector<8x128xf32> to vector<8x32xf32>
    %312 = vector.extract_strided_slice %309 {offsets = [0, 64], sizes = [8, 32], strides = [1, 1]} : vector<8x128xf32> to vector<8x32xf32>
    %313 = vector.extract_strided_slice %308 {offsets = [0, 96], sizes = [8, 32], strides = [1, 1]} : vector<8x128xf32> to vector<8x32xf32>
    %314 = arith.mulf %311, %277 : vector<8x32xf32>
    %315 = arith.mulf %310, %312 : vector<8x32xf32>
    %316 = arith.addf %314, %315 : vector<8x32xf32>
    %317 = math.tanh %316 : vector<8x32xf32>
    %318 = arith.mulf %313, %317 : vector<8x32xf32>
    %319 = arith.truncf %318 : vector<8x32xf32> to vector<8x32xbf16>
    %320 = tpu.concatenate %299, %319 in 1 : vector<8x32xbf16>, vector<8x32xbf16> -> vector<8x64xbf16>
    %cst_46 = arith.constant dense<0.000000e+00> : vector<8x128xf32>
    %321 = tpu.matmul %320, %1, %cst_46 {dimension_numbers = #tpu.dot_dimension_numbers<[1], [0], [0], [1], [0, 0, 1, 1], [], []>} : vector<8x64xbf16>, vector<64x128xbf16>, vector<8x128xf32> -> vector<8x128xf32>
    %322 = vector.broadcast %2 : vector<1x128xf32> to vector<8x128xf32>
    %323 = arith.addf %321, %322 : vector<8x128xf32>
    %324 = arith.negf %323 : vector<8x128xf32>
    %325 = math.exp %324 : vector<8x128xf32>
    %cst_47 = arith.constant 1.000000e+00 : f32
    %326 = vector.broadcast %cst_47 : f32 to vector<8x128xf32>
    %327 = arith.addf %326, %325 : vector<8x128xf32>
    %328 = arith.divf %326, %327 : vector<8x128xf32>
    %329 = math.tanh %323 : vector<8x128xf32>
    %330 = vector.extract_strided_slice %328 {offsets = [0, 0], sizes = [8, 32], strides = [1, 1]} : vector<8x128xf32> to vector<8x32xf32>
    %331 = vector.extract_strided_slice %328 {offsets = [0, 32], sizes = [8, 32], strides = [1, 1]} : vector<8x128xf32> to vector<8x32xf32>
    %332 = vector.extract_strided_slice %329 {offsets = [0, 64], sizes = [8, 32], strides = [1, 1]} : vector<8x128xf32> to vector<8x32xf32>
    %333 = vector.extract_strided_slice %328 {offsets = [0, 96], sizes = [8, 32], strides = [1, 1]} : vector<8x128xf32> to vector<8x32xf32>
    %334 = arith.mulf %331, %316 : vector<8x32xf32>
    %335 = arith.mulf %330, %332 : vector<8x32xf32>
    %336 = arith.addf %334, %335 : vector<8x32xf32>
    %337 = math.tanh %336 : vector<8x32xf32>
    %338 = arith.mulf %333, %337 : vector<8x32xf32>
    %c0_48 = arith.constant 0 : index
    %c0_49 = arith.constant 0 : index
    %339 = vector.load %arg7[%c0_48, %c0_49] : memref<1x32xf32, #tpu.memory_space<vmem>>, vector<1x32xf32>
    %c0_50 = arith.constant 0 : index
    %c0_51 = arith.constant 0 : index
    %340 = vector.load %arg10[%c0_50, %c0_51] : memref<1x32xf32, #tpu.memory_space<vmem>>, vector<1x32xf32>
    %cst_52 = arith.constant 9.99999974E-6 : f32
    %341 = vector.broadcast %cst_52 : f32 to vector<1x32xf32>
    %342 = arith.addf %340, %341 : vector<1x32xf32>
    %343 = math.rsqrt %342 : vector<1x32xf32>
    %344 = arith.mulf %339, %343 : vector<1x32xf32>
    %c0_53 = arith.constant 0 : index
    %c0_54 = arith.constant 0 : index
    %345 = vector.load %arg8[%c0_53, %c0_54] : memref<1x32xf32, #tpu.memory_space<vmem>>, vector<1x32xf32>
    %c0_55 = arith.constant 0 : index
    %c0_56 = arith.constant 0 : index
    %346 = vector.load %arg9[%c0_55, %c0_56] : memref<1x32xf32, #tpu.memory_space<vmem>>, vector<1x32xf32>
    %347 = arith.mulf %346, %344 : vector<1x32xf32>
    %348 = arith.subf %345, %347 : vector<1x32xf32>
    %349 = vector.broadcast %344 : vector<1x32xf32> to vector<8x32xf32>
    %350 = arith.mulf %338, %349 : vector<8x32xf32>
    %351 = vector.broadcast %348 : vector<1x32xf32> to vector<8x32xf32>
    %352 = arith.addf %350, %351 : vector<8x32xf32>
    %353 = arith.truncf %352 : vector<8x32xf32> to vector<8x32xbf16>
    %c0_57 = arith.constant 0 : index
    %c0_58 = arith.constant 0 : index
    %354 = vector.load %arg11[%c0_57, %c0_58] : memref<32x64xbf16, #tpu.memory_space<vmem>>, vector<32x64xbf16>
    %cst_59 = arith.constant dense<0.000000e+00> : vector<8x64xf32>
    %355 = tpu.matmul %353, %354, %cst_59 {dimension_numbers = #tpu.dot_dimension_numbers<[1], [0], [0], [1], [0, 0, 1, 1], [], []>} : vector<8x32xbf16>, vector<32x64xbf16>, vector<8x64xf32> -> vector<8x64xf32>
    %c0_60 = arith.constant 0 : index
    %c0_61 = arith.constant 0 : index
    %356 = vector.load %arg12[%c0_60, %c0_61] : memref<1x64xf32, #tpu.memory_space<vmem>>, vector<1x64xf32>
    %357 = vector.broadcast %356 : vector<1x64xf32> to vector<8x64xf32>
    %358 = arith.addf %355, %357 : vector<8x64xf32>
    %cst_62 = arith.constant 0.000000e+00 : f32
    %359 = vector.broadcast %cst_62 : f32 to vector<8x64xf32>
    %360 = arith.maximumf %358, %359 : vector<8x64xf32>
    %361 = arith.truncf %360 : vector<8x64xf32> to vector<8x64xbf16>
    %c0_63 = arith.constant 0 : index
    %c0_64 = arith.constant 0 : index
    %362 = vector.load %arg13[%c0_63, %c0_64] : memref<64x128xbf16, #tpu.memory_space<vmem>>, vector<64x128xbf16>
    %cst_65 = arith.constant dense<0.000000e+00> : vector<8x128xf32>
    %363 = tpu.matmul %361, %362, %cst_65 {dimension_numbers = #tpu.dot_dimension_numbers<[1], [0], [0], [1], [0, 0, 1, 1], [], []>} : vector<8x64xbf16>, vector<64x128xbf16>, vector<8x128xf32> -> vector<8x128xf32>
    %c0_66 = arith.constant 0 : index
    %c0_67 = arith.constant 0 : index
    %364 = vector.load %arg14[%c0_66, %c0_67] : memref<1x128xf32, #tpu.memory_space<vmem>>, vector<1x128xf32>
    %365 = vector.broadcast %364 : vector<1x128xf32> to vector<8x128xf32>
    %366 = arith.addf %363, %365 : vector<8x128xf32>
    %c0_68 = arith.constant 0 : index
    %c0_69 = arith.constant 0 : index
    %367 = vector.load %arg15[%c0_68, %c0_69] : memref<8x128xf32, #tpu.memory_space<vmem>>, vector<8x128xf32>
    tpu.vector_store %arg15[%c0_68, %c0_69], %366 {strides = array<i32>} : memref<8x128xf32, #tpu.memory_space<vmem>>, vector<8x128xf32>,
    return
  }
}

</mosaic_0001>

<bundles_post_ra>
// kernel: leonard_lstm_multi_bn_forward.1
= control target key start
LH: loop header
LB: loop body
LE: loop exit
PB: predicated region body
PF: predicated region fallthrough
CT: control target
= control target key end

     0   :  { %20 = vsyncpa [#allocation3], 0  ;;  %s2909_s0 = inlined_call_operand.vmem [shape: s32[8,8], index: 0, kind: input, shape index: {}]   ;;  %s2910_s1 = inlined_call_operand.vmem [shape: bf16[128,32], index: 1, kind: input, shape index: {}]   ;;  %s2911_s2 = inlined_call_operand.vmem [shape: bf16[32,128], index: 2, kind: input, shape index: {}]   ;;  %s2912_s3 = inlined_call_operand.vmem [shape: bf16[32,128], index: 3, kind: input, shape index: {}]   ;;  %s2913_s4 = inlined_call_operand.hbm [shape: f32[1,128], index: 4, kind: input, shape index: {}]   ;;  %s2914_s5 = inlined_call_operand.vmem [shape: bf16[64,128], index: 5, kind: input, shape index: {}]   ;;  %s2915_s6 = inlined_call_operand.hbm [shape: f32[1,128], index: 6, kind: input, shape index: {}]   ;;  %s2916_s7 = inlined_call_operand.vmem [shape: f32[1,32], index: 7, kind: input, shape index: {}]   ;;  %s2917_s8 = inlined_call_operand.hbm [shape: f32[1,32], index: 8, kind: input, shape index: {}]   ;;  %s2918_s9 = inlined_call_operand.vmem [shape: f32[1,32], index: 9, kind: input, shape index: {}]   ;;  %s2919_s10 = inlined_call_operand.vmem [shape: f32[1,32], index: 10, kind: input, shape index: {}]   ;;  %s2920_s11 = inlined_call_operand.hbm [shape: bf16[32,64], index: 11, kind: input, shape index: {}]   ;;  %s2921_s12 = inlined_call_operand.vmem [shape: f32[1,64], index: 12, kind: input, shape index: {}]   ;;  %s2922_s13 = inlined_call_operand.vmem [shape: bf16[64,128], index: 13, kind: input, shape index: {}]   ;;  %s2923_s14 = inlined_call_operand.vmem [shape: f32[1,128], index: 14, kind: input, shape index: {}]   ;;  %s2924_s15 = inlined_call_operand.vmem [shape: f32[8,128], index: 15, kind: output, shape index: {}]  }
   0x1   :  { %21 = vsyncpa [#allocation5], 0 }
   0x2   :  { %22 = vsyncpa [#allocation8], 0  ;;  %s2387_s18 = smov [#allocation4]   ;;  %s2388_s20 = smov [#allocation2]  }
   0x3   :  { %s49_s19 = sshll.u32 %s2387_s18, 4  ;;  %s37_s21 = sshll.u32 %s2388_s20, 4  ;;  %s50_s19 = int_to_ptr.vmem [resolvable:$true] %s49_s19  ;;  %s38_s21 = int_to_ptr.vmem [resolvable:$true] %s37_s21 }
   0x4   :  { %s2309_s22 = scalar_lea.vmem %s50_s19, 16  ;;  %s2313_s23 = scalar_lea.vmem %s50_s19, 32 }
   0x5   :  { %p2310_p0 = scmp.ne.s32.totalorder %s50_s19, %s2309_s22  ;;  %p2314_p1 = scmp.lt.s32.totalorder %s50_s19, %s50_s19 }
   0x6   :  { %p2315_p2 = scmp.lt.s32.totalorder %s2313_s23, %s2309_s22 }
   0x8   :  { %p2316_p3 = por %p2315_p2, %p2314_p1 }
   0xa   :  { %p2317_p4 = pnand %p2316_p3, %p2310_p0 }
   0xc   :  { %2320 = shalt.err (!%p2317_p4)
}
   0xd   :  { %52 = dma.hbm_to_vmem [thread:$0]  %s2915_s6, 16, %s50_s19, [#allocation5]  }
   0xe   :  { %s2329_s26 = scalar_lea.vmem %s38_s21, 16  ;;  %s2333_s27 = scalar_lea.vmem %s38_s21, 32 }
   0xf   :  { %p2330_p5 = scmp.ne.s32.totalorder %s38_s21, %s2329_s26  ;;  %p2334_p6 = scmp.lt.s32.totalorder %s38_s21, %s38_s21 }
  0x10   :  { %p2335_p7 = scmp.lt.s32.totalorder %s2333_s27, %s2329_s26 }
  0x12   :  { %p2336_p8 = por %p2335_p7, %p2334_p6 }
  0x14   :  { %p2337_p9 = pnand %p2336_p8, %p2330_p5 }
  0x16   :  { %2340 = shalt.err (!%p2337_p9)
}
  0x17   :  { %40 = dma.hbm_to_vmem [thread:$0]  %s2913_s4, 16, %s38_s21, [#allocation3]  }
  0x18   :  { %s2389_s30 = smov [#allocation6]   ;;  %s2390_s17 = smov [#allocation7]  }
  0x19   :  { %s61_s16 = sshll.u32 %s2389_s30, 4  ;;  %s74_s18 = sshll.u32 %s2390_s17, 4  ;;  %s62_s16 = int_to_ptr.vmem [resolvable:$true] %s61_s16  ;;  %s75_s18 = int_to_ptr.vmem [resolvable:$true] %s74_s18 }
  0x1a   :  { %s2349_s20 = scalar_lea.vmem %s62_s16, 16  ;;  %s2353_s6 = scalar_lea.vmem %s62_s16, 32 }
  0x1b   :  { %p2350_p10 = scmp.ne.s32.totalorder %s62_s16, %s2349_s20  ;;  %p2354_p11 = scmp.lt.s32.totalorder %s62_s16, %s62_s16 }
  0x1c   :  { %p2355_p12 = scmp.lt.s32.totalorder %s2353_s6, %s2349_s20 }
  0x1e   :  { %p2356_p13 = por %p2355_p12, %p2354_p11 }
  0x20   :  { %p2357_p0 = pnand %p2356_p13, %p2350_p10 }
  0x22   :  { %2360 = shalt.err (!%p2357_p0)
}
  0x23   :  { %64 = dma.hbm_to_vmem [thread:$0]  %s2917_s8, 16, %s62_s16, [#allocation5]  }
  0x24   :  { %s2369_s23 = scalar_lea.vmem %s75_s18, 256  ;;  %p2374_p2 = scmp.lt.s32.totalorder %s75_s18, %s75_s18 }
  0x25   :  { %p2370_p1 = scmp.ne.s32.totalorder %s75_s18, %s2369_s23  ;;  %p2375_p3 = scmp.lt.s32.totalorder %s2369_s23, %s2369_s23 }
  0x27   :  { %p2376_p4 = por %p2375_p3, %p2374_p2 }
  0x29   :  { %p2377_p5 = pnand %p2376_p4, %p2370_p1 }
  0x2b   :  { %2380 = shalt.err (!%p2377_p5)
}
  0x2c   :  { %s2391_s4 = smov 64   ;;  %s2392_s21 = smov 4  }
  0x2d   :  { %80 = dma.hbm_to_vmem [thread:$0]  %s2920_s11, 256, %s75_s18, [#allocation8], %s2391_s4, %s2391_s4, %s2392_s21  }
  0x2e   :  { %2381 = dma.done.wait [#allocation3], 16  }
  0x2f   :  { %2382 = vsyncadd [#allocation3], 4294967280 }
  0x30   :  { %2383 = dma.done.wait [#allocation5], 32  }
  0x31   :  { %2384 = vsyncadd [#allocation5], 4294967264 }
  0x32   :  { %2385 = dma.done.wait [#allocation8], 256  }
  0x33   :  { %2386 = vsyncadd [#allocation8], 4294967040  ;;  %v2393_v0 = vmov 0   ;;  %v113_v1 = vld [vmem:[%s2909_s0] sm:$0xff]  ;;  %s2394_s27 = smov 127   ;;  %s2395_s28 = smov 125   ;;  %v128_v13 = vlaneseq }
  0x34   :  { %2147 = vset.pattern.permute.xlu0 %v2393_v0  ;;  %2146 = vset.pattern.permute.xlu1 %v2393_v0  ;;  %v2148_v2 = vld [vmem:[%s2910_s1 + $0x38] sm:$0xff]   ;;  %v2149_v3 = vld [vmem:[%s2910_s1 + $0x30] sm:$0xff]   ;;  %s2396_s17 = smov 126   ;;  %v2150_v4 = vld [vmem:[%s2910_s1 + $0x28] sm:$0xff]   ;;  %s2399_s29 = smov 123   ;;  %vm338_vm12 = vcmask 261120  }
  0x35   :  { %114 = vrot.lane.b32.xlu0 %v113_v1, %s2394_s27  ;;  %118 = vrot.lane.b32.xlu1 %v113_v1, %s2395_s28  ;;  %v2151_v5 = vld [vmem:[%s2910_s1 + $0x20] sm:$0xff]   ;;  %v2152_v6 = vld [vmem:[%s2910_s1 + $0x18] sm:$0xff]   ;;  %s2397_s27 = smov 124   ;;  %s2398_s28 = smov 122   ;;  %v129_v14 = vand.u32 127, %v128_v13  ;;  %v2403_v57 = vmov 0.0  }
  0x36   :  { %1919 = vmatprep.subr.bf16.mxu0 %v2148_v2  ;;  %v2153_v7 = vld [vmem:[%s2910_s1 + $0x10] sm:$0xff]   ;;  %v2154_v8 = vld [vmem:[%s2910_s1 + $0x8] sm:$0xff]   ;;  %v2155_v10 = vld [vmem:[%s2910_s1] sm:$0xff]   ;;  %s2400_s30 = smov 121   ;;  %v2401_v17 = vmov 1.0|1.0  }
  0x37   :  { %1920 = vmatpush3.bf16.msra.mxu0 %v2148_v2  ;;  %v2156_v24 = vld [vmem:[%s2911_s2 + $0x8] sm:$0xff]   ;;  %v2157_v25 = vld [vmem:[%s2911_s2] sm:$0xff]   ;;  %s2402_s2 = smov 32   ;;  %vm2404_vm13 = vmmov 0   ;;  %v2577_v63 = vld [vmem:[%s2914_s5 + $0x18] sm:$0xff]   ;;  %vm557_vm14 = vcmask 523264  }
  0x38   :  { %1921 = vmatprep.subr.bf16.mxu0 %v2149_v3  ;;  %1943 = vmatprep.subr.bf16.mxu1 %v2156_v24  ;;  %v2540_v43 = vld [vmem:[#allocation2] ss:$0 sm:$0xff]  ;;  %v2551_v56 = vld [vmem:[%s2912_s3 + $0x8] sm:$0xff]  }
  0x39   :  { %116 = vrot.lane.b32.xlu0 %v113_v1, %s2396_s17  ;;  %131 = vperm.xlu1 %2146, %v113_v1   ;;  %v2560_v58 = vld [vmem:[%s2912_s3] sm:$0xff]   ;;  %v2593_v2 = vld [vmem:[%s2914_s5 + $0x8] sm:$0xff]  }
  0x3a   :  { %1944 = vmatpush3.bf16.msra.mxu1 %v2156_v24 }
  0x3b   :  { %1922 = vmatpush3.bf16.msra.mxu0 %v2149_v3  ;;  %1945 = vmatprep.subr.bf16.mxu1 %v2157_v25  ;;  %v2600_v3 = vld [vmem:[%s2914_s5] sm:$0xff]  }
  0x3c   :  { %1923 = vmatprep.subr.bf16.mxu0 %v2150_v4 }
  0x3e   :  { %1946 = vmatpush3.bf16.msra.mxu1 %v2157_v25 }
  0x3f   :  { %1924 = vmatpush3.bf16.msra.mxu0 %v2150_v4  ;;  %1955 = vmatprep.subr.bf16.mxu1 %v2403_v57 }
  0x40   :  { %1925 = vmatprep.subr.bf16.mxu0 %v2151_v5 }
  0x43   :  { %1926 = vmatpush3.bf16.msra.mxu0 %v2151_v5 }
  0x44   :  { %1927 = vmatprep.subr.bf16.mxu0 %v2152_v6 }
  0x47   :  { %1928 = vmatpush3.bf16.msra.mxu0 %v2152_v6 }
  0x48   :  { %1929 = vmatprep.subr.bf16.mxu0 %v2153_v7 }
  0x4b   :  { %1930 = vmatpush3.bf16.msra.mxu0 %v2153_v7 }
  0x4c   :  { %1931 = vmatprep.subr.bf16.mxu0 %v2154_v8 }
  0x4f   :  { %1932 = vmatpush3.bf16.msra.mxu0 %v2154_v8 }
  0x50   :  { %1933 = vmatprep.subr.bf16.mxu0 %v2155_v10 }
  0x53   :  { %1934 = vmatpush3.bf16.msra.mxu0 %v2155_v10 }
  0x54   :  { %1975 = vmatprep.subr.bf16.mxu0 %v2403_v57 }
  0xa7   :  { %v115_v9 = vpop.permute.xlu0 %114  ;;  %v119_v12 = vpop.permute.xlu1 %118 }
  0xa8   :  { %134 = vperm.xlu0 %2147, %v115_v9  }
  0xab   :  { %v117_v11 = vpop.permute.xlu0 %116 }
  0xac   :  { %137 = vperm.xlu1 %2146, %v117_v11   ;;  %120 = vrot.lane.b32.xlu0 %v113_v1, %s2397_s27 }
  0xb0   :  { %140 = vperm.xlu1 %2146, %v119_v12   ;;  %124 = vrot.lane.b32.xlu0 %v113_v1, %s2398_s28 }
  0xb4   :  { %122 = vrot.lane.b32.xlu1 %v113_v1, %s2399_s29  ;;  %v132_v15 = vpop.permute.xlu1 %131 }
  0xb5   :  { %vm154_vm0 = vcmp.eq.s32.totalorder %v132_v15, %v129_v14 }
  0xb8   :  { %126 = vrot.lane.b32.xlu1 %v113_v1, %s2400_s30  ;;  %v2584_v1 = vld [vmem:[%s2914_s5 + $0x10] sm:$0xff]  }
 0x123   :  { %v135_v16 = vpop.permute.xlu0 %134 }
 0x124   :  { %vm155_vm1 = vcmp.eq.s32.totalorder %v135_v16, %v129_v14 }
 0x125   :  { %vm1769_vm2 = vmpackc.low %vm155_vm1, %vm154_vm0 }
 0x126   :  { %1935 = vmatprep.mubr.msk.bf16.mxu0 %vm1769_vm2, %v2401_v17 }
 0x127   :  { %v138_v18 = vpop.permute.xlu1 %137  ;;  %v121_v19 = vpop.permute.xlu0 %120 }
 0x128   :  { %143 = vperm.xlu0 %2147, %v121_v19   ;;  %vm156_vm3 = vcmp.eq.s32.totalorder %v138_v18, %v129_v14  ;;  %v2628_v18 = vld [vmem:[#allocation4] ss:$0 sm:$0xff] }
 0x12b   :  { %v141_v20 = vpop.permute.xlu1 %140  ;;  %v125_v21 = vpop.permute.xlu0 %124 }
 0x12c   :  { %vm157_vm4 = vcmp.eq.s32.totalorder %v141_v20, %v129_v14  ;;  %149 = vperm.xlu0 %2147, %v125_v21  }
 0x12d   :  { %vm1771_vm5 = vmpackc.low %vm157_vm4, %vm156_vm3 }
 0x12e   :  { %1936 = vmatmul.mubr.msk.bf16.vlgmr.msra.gmra.mxu0 %vm1771_vm5, %v2401_v17 }
 0x12f   :  { %v123_v22 = vpop.permute.xlu1 %122  ;;  %1976 = vmatpush3.bf16.msra.mxu0 %v2551_v56 }
 0x130   :  { %146 = vperm.xlu1 %2146, %v123_v22   ;;  %1977 = vmatprep.subr.bf16.mxu0 %v2403_v57 }
 0x133   :  { %v127_v23 = vpop.permute.xlu1 %126  ;;  %1978 = vmatpush3.bf16.msra.mxu0 %v2560_v58 }
 0x134   :  { %152 = vperm.xlu1 %2146, %v127_v23   ;;  %1995 = vmatprep.subr.bf16.mxu0 %v2403_v57 }
 0x1a3   :  { %v144_v26 = vpop.permute.xlu0 %143 }
 0x1a4   :  { %vm158_vm6 = vcmp.eq.s32.totalorder %v144_v26, %v129_v14 }
 0x1a7   :  { %v150_v28 = vpop.permute.xlu0 %149 }
 0x1a8   :  { %vm160_vm9 = vcmp.eq.s32.totalorder %v150_v28, %v129_v14 }
 0x1ab   :  { %v147_v27 = vpop.permute.xlu1 %146 }
 0x1ac   :  { %vm159_vm7 = vcmp.eq.s32.totalorder %v147_v27, %v129_v14 }
 0x1ad   :  { %vm1773_vm8 = vmpackc.low %vm159_vm7, %vm158_vm6 }
 0x1ae   :  { %1939 = vmatprep.mubr.msk.bf16.mxu0 %vm1773_vm8, %v2401_v17 }
 0x1af   :  { %v153_v29 = vpop.permute.xlu1 %152 }
 0x1b0   :  { %vm161_vm10 = vcmp.eq.s32.totalorder %v153_v29, %v129_v14 }
 0x1b1   :  { %vm1775_vm11 = vmpackc.low %vm161_vm10, %vm160_vm9 }
 0x1b2   :  { %1940 = vmatmul.mubr.msk.bf16.gmra.mxu0 %vm1775_vm11, %v2401_v17 }
 0x1b3   :  { %1979 = vmatprep.mubr.msk.bf16.mxu0 %vm2404_vm13, %v2403_v57 }
 0x1ee   :  { %v1937_v30 = vpop.f32.mrf.mxu0 }
 0x1f0   :  { %v280_v31 = vpop.f32.mrf.mxu0 }
 0x1f2   :  { %v1938_v32 = vpop.f32.mrf.mxu0 }
 0x1f3   :  { %v312_v35 = vpack.c.bf16 %v1938_v32, %v1937_v30 }
 0x1f4   :  { %v283_v33 = vpop.f32.mrf.mxu0 }
 0x1f5   :  { %v311_v34 = vpack.c.bf16 %v283_v33, %v280_v31 }
 0x1f7   :  { %1947 = vmatprep.mubr.msk.bf16.mxu1 %vm338_vm12, %v311_v34 }
 0x1f8   :  { %1948 = vmatmul.mubr.msk.bf16.vlgmr.msra.gmra.mxu1 %vm338_vm12, %v312_v35 }
 0x1f9   :  { %1956 = vmatpush3.bf16.msra.mxu1 %v2551_v56 }
 0x1fa   :  { %1957 = vmatprep.subr.bf16.mxu1 %v2403_v57 }
 0x1fd   :  { %1958 = vmatpush3.bf16.msra.mxu1 %v2560_v58 }
 0x1fe   :  { %1963 = vmatprep.subr.bf16.mxu1 %v2403_v57 }
 0x272   :  { %v1941_v36 = vpop.f32.mrf.mxu0 }
 0x274   :  { %v296_v37 = vpop.f32.mrf.mxu0 }
 0x276   :  { %v1942_v38 = vpop.f32.mrf.mxu0 }
 0x277   :  { %v314_v41 = vpack.c.bf16 %v1942_v38, %v1941_v36 }
 0x278   :  { %v299_v39 = vpop.f32.mrf.mxu0 }
 0x279   :  { %v313_v40 = vpack.c.bf16 %v299_v39, %v296_v37 }
 0x27b   :  { %1951 = vmatprep.mubr.msk.bf16.mxu1 %vm338_vm12, %v313_v40 }
 0x27c   :  { %1952 = vmatmul.mubr.msk.bf16.gmra.mxu1 %vm338_vm12, %v314_v41 }
 0x27d   :  { %1959 = vmatprep.mubr.msk.bf16.mxu1 %vm2404_vm13, %v2403_v57 }
 0x2b8   :  { %v2538_v42 = vpop.f32.mrf.mxu1 }
 0x2ba   :  { %v385_v44 = vpop.f32.mrf.mxu1 }
 0x2bb   :  { %v386_v45 = vadd.f32 %v2540_v43, %v385_v44 }
 0x2bc   :  { %v2617_v5 = vpop.f32.mrf.mxu1 }
 0x2bd   :  { %2170 = vtanh.f32 %v386_v45  ;;  %v1784_v47 = vmul.f32 -1.442695, %v386_v45 }
 0x2be   :  { %v388_v6 = vpop.f32.mrf.mxu1 }
 0x2bf   :  { %2172 = vpow2.f32 %v1784_v47  ;;  %v389_v11 = vadd.f32 %v2540_v43, %v388_v6 }
 0x2ca   :  { %v2171_v46 = vpop.eup %2170 }
 0x2cb   :  { %425 = vrot.lane.b32.xlu0 %v2171_v46, %s2391_s4 }
 0x2cc   :  { %v2173_v48 = vpop.eup %2172 }
 0x2cd   :  { %v419_v49 = vadd.f32 1.0, %v2173_v48 }
 0x2cf   :  { %2174 = vrcp.f32 %v419_v49 }
 0x2dc   :  { %v2175_v50 = vpop.eup %2174 }
 0x2dd   :  { %v423_v53 = vmul.f32 0.0, %v2175_v50 }
 0x33c   :  { %v2619_v7 = vpop.f32.mrf.mxu1 }
 0x33d   :  { %v426_v51 = vpop.permute.xlu0 %425 }
 0x33e   :  { %v428_v52 = vmul.f32 %v2175_v50, %v426_v51  ;;  %v2621_v8 = vpop.f32.mrf.mxu1 }
 0x340   :  { %430 = vrot.lane.b32.xlu1 %v428_v52, %s2402_s2  ;;  %v2623_v9 = vpop.f32.mrf.mxu1 }
 0x342   :  { %v2625_v10 = vpop.f32.mrf.mxu1 }
 0x3b2   :  { %v431_v54 = vpop.permute.xlu1 %430 }
 0x3b3   :  { %v2545_v55 = vadd.f32 %v431_v54, %v423_v53 }
 0x3b5   :  { %2176 = vtanh.f32 %v2545_v55 }
 0x3c2   :  { %v2177_v59 = vpop.eup %2176 }
 0x3c3   :  { %436 = vrot.lane.b32.xlu0 %v2177_v59, %s2391_s4 }
 0x435   :  { %v437_v60 = vpop.permute.xlu0 %436 }
 0x436   :  { %v439_v61 = vmul.f32 %v2175_v50, %v437_v60  ;;  %v394_v60 = vadd.f32 %v2538_v42, %v2540_v43 }
 0x438   :  { %v440_v62 = vpack.c.bf16 %v439_v61, %v439_v61 }
 0x43a   :  { %442 = vrot.lane.b32.xlu1 %v440_v62, %s2402_s2 }
 0x4ac   :  { %v443_v0 = vpop.permute.xlu1 %442 }
 0x4ad   :  { %1960 = vmatmul.mubr.msk.bf16.vlgmr.msra.gmra.mxu1 %vm338_vm12, %v443_v0  ;;  %v526_v4 = vsel %vm338_vm12, %v443_v0, 0 }
 0x4ae   :  { %1964 = vmatpush3.bf16.msra.mxu1 %v2577_v63  ;;  %1971 = vmatprep.mubr.msk.bf16.mxu1 %vm2404_vm13, %v2403_v57 }
 0x4af   :  { %1965 = vmatprep.subr.bf16.mxu1 %v2403_v57 }
 0x4b2   :  { %1966 = vmatpush3.bf16.msra.mxu1 %v2584_v1 }
 0x4b3   :  { %1967 = vmatprep.subr.bf16.mxu1 %v2403_v57 }
 0x4b6   :  { %1968 = vmatpush3.bf16.msra.mxu1 %v2593_v2 }
 0x4b7   :  { %1969 = vmatprep.subr.bf16.mxu1 %v2403_v57 }
 0x4ba   :  { %1970 = vmatpush3.bf16.msra.mxu1 %v2600_v3 }
 0x4bb   :  { %1983 = vmatprep.subr.bf16.mxu1 %v2403_v57 }
 0x4bd   :  { %1972 = vmatmul.mubr.msk.bf16.vlgmr.msra.gmra.mxu1 %vm557_vm14, %v526_v4 }
 0x4be   :  { %1984 = vmatpush3.bf16.msra.mxu1 %v2577_v63  ;;  %1991 = vmatprep.mubr.msk.bf16.mxu1 %vm2404_vm13, %v2403_v57 }
 0x4bf   :  { %1985 = vmatprep.subr.bf16.mxu1 %v2403_v57 }
 0x4c2   :  { %1986 = vmatpush3.bf16.msra.mxu1 %v2584_v1 }
 0x4c3   :  { %1987 = vmatprep.subr.bf16.mxu1 %v2403_v57 }
 0x4c6   :  { %1988 = vmatpush3.bf16.msra.mxu1 %v2593_v2 }
 0x4c7   :  { %1989 = vmatprep.subr.bf16.mxu1 %v2403_v57 }
 0x4ca   :  { %1990 = vmatpush3.bf16.msra.mxu1 %v2600_v3 }
 0x4cb   :  { %2015 = vmatprep.subr.bf16.mxu1 %v2403_v57 }
 0x56d   :  { %v493_v12 = vpop.f32.mrf.mxu1 }
 0x56e   :  { %v499_v14 = vadd.f32 %v493_v12, %v389_v11 }
 0x56f   :  { %v1961_v15 = vpop.f32.mrf.mxu1 }
 0x570   :  { %2178 = vtanh.f32 %v499_v14  ;;  %v1788_v26 = vmul.f32 -1.442695, %v499_v14 }
 0x571   :  { %v496_v16 = vpop.f32.mrf.mxu1 }
 0x573   :  { %v1962_v17 = vpop.f32.mrf.mxu1 }
 0x57d   :  { %v2179_v19 = vpop.eup %2178  ;;  %v594_v20 = vpop.f32.mrf.mxu1 }
 0x57e   :  { %v595_v21 = vadd.f32 %v2628_v18, %v594_v20  ;;  %509 = vrot.lane.b32.xlu0 %v2179_v19, %s2391_s4 }
 0x57f   :  { %v1973_v22 = vpop.f32.mrf.mxu1 }
 0x580   :  { %2180 = vtanh.f32 %v595_v21  ;;  %v1795_v27 = vmul.f32 -1.442695, %v595_v21 }
 0x581   :  { %v597_v23 = vpop.f32.mrf.mxu1  ;;  %2182 = vpow2.f32 %v1788_v26 }
 0x582   :  { %2184 = vpow2.f32 %v1795_v27 }
 0x583   :  { %v1974_v24 = vpop.f32.mrf.mxu1 }
 0x58d   :  { %v2181_v25 = vpop.eup %2180 }
 0x58e   :  { %609 = vrot.lane.b32.xlu1 %v2181_v25, %s2391_s4  ;;  %v2183_v28 = vpop.eup %2182 }
 0x58f   :  { %v503_v29 = vadd.f32 1.0, %v2183_v28  ;;  %v2185_v30 = vpop.eup %2184 }
 0x590   :  { %v603_v31 = vadd.f32 1.0, %v2185_v30 }
 0x591   :  { %2186 = vrcp.f32 %v503_v29 }
 0x592   :  { %2188 = vrcp.f32 %v603_v31 }
 0x59e   :  { %v2187_v32 = vpop.eup %2186 }
 0x59f   :  { %v2189_v35 = vpop.eup %2188  ;;  %v507_v38 = vmul.f32 %v2187_v32, %v2545_v55 }
 0x5a0   :  { %v607_v41 = vmul.f32 0.0, %v2189_v35 }
 0x5f0   :  { %v510_v33 = vpop.permute.xlu0 %509 }
 0x5f1   :  { %v512_v34 = vmul.f32 %v2187_v32, %v510_v33 }
 0x5f3   :  { %514 = vrot.lane.b32.xlu0 %v512_v34, %s2402_s2 }
 0x600   :  { %v610_v36 = vpop.permute.xlu1 %609 }
 0x601   :  { %v612_v37 = vmul.f32 %v2189_v35, %v610_v36 }
 0x603   :  { %614 = vrot.lane.b32.xlu1 %v612_v37, %s2402_s2 }
 0x665   :  { %v515_v39 = vpop.permute.xlu0 %514 }
 0x666   :  { %v2636_v40 = vadd.f32 %v515_v39, %v507_v38 }
 0x668   :  { %2190 = vtanh.f32 %v2636_v40 }
 0x675   :  { %v2191_v44 = vpop.eup %2190  ;;  %v615_v45 = vpop.permute.xlu1 %614 }
 0x676   :  { %v2639_v46 = vadd.f32 %v615_v45, %v607_v41  ;;  %520 = vrot.lane.b32.xlu0 %v2191_v44, %s2391_s4 }
 0x678   :  { %2192 = vtanh.f32 %v2639_v46 }
 0x685   :  { %v2193_v47 = vpop.eup %2192 }
 0x686   :  { %620 = vrot.lane.b32.xlu1 %v2193_v47, %s2391_s4 }
 0x6e8   :  { %v521_v48 = vpop.permute.xlu0 %520 }
 0x6e9   :  { %v523_v49 = vmul.f32 %v2187_v32, %v521_v48 }
 0x6eb   :  { %v524_v50 = vpack.c.bf16 %v523_v49, %v523_v49 }
 0x6ed   :  { %626 = vrot.lane.b32.xlu0 %v524_v50, %s2402_s2  ;;  %v397_v50 = vadd.f32 %v2617_v5, %v2540_v43 }
 0x6f8   :  { %v621_v51 = vpop.permute.xlu1 %620 }
 0x6f9   :  { %v623_v52 = vmul.f32 %v2189_v35, %v621_v51 }
 0x6fb   :  { %v624_v53 = vpack.c.bf16 %v623_v52, %v623_v52 }
 0x6fd   :  { %698 = vrot.lane.b32.xlu1 %v624_v53, %s2391_s4 }
 0x75f   :  { %v627_v54 = vpop.permute.xlu0 %626 }
 0x760   :  { %1980 = vmatmul.mubr.msk.bf16.vlgmr.msra.gmra.mxu0 %vm338_vm12, %v627_v54 }
 0x761   :  { %1996 = vmatpush3.bf16.msra.mxu0 %v2551_v56  ;;  %1999 = vmatprep.mubr.msk.bf16.mxu0 %vm2404_vm13, %v2403_v57 }
 0x762   :  { %1997 = vmatprep.subr.bf16.mxu0 %v2403_v57 }
 0x765   :  { %1998 = vmatpush3.bf16.msra.mxu0 %v2560_v58 }
 0x766   :  { %2003 = vmatprep.subr.bf16.mxu0 %v2403_v57 }
 0x76f   :  { %v699_v55 = vpop.permute.xlu1 %698 }
 0x770   :  { %v701_v59 = vsel %vm338_vm12, %v627_v54, %v699_v55 }
 0x771   :  { %1992 = vmatmul.mubr.msk.bf16.vlgmr.msra.gmra.mxu1 %vm557_vm14, %v701_v59 }
 0x772   :  { %2016 = vmatpush3.bf16.msra.mxu1 %v2551_v56  ;;  %2019 = vmatprep.mubr.msk.bf16.mxu1 %vm2404_vm13, %v2403_v57 }
 0x773   :  { %2017 = vmatprep.subr.bf16.mxu1 %v2403_v57 }
 0x776   :  { %2018 = vmatpush3.bf16.msra.mxu1 %v2560_v58 }
 0x777   :  { %2023 = vmatprep.subr.bf16.mxu1 %v2403_v57 }
 0x820   :  { %v665_v61 = vpop.f32.mrf.mxu0 }
 0x821   :  { %v671_v62 = vadd.f32 %v665_v61, %v394_v60 }
 0x822   :  { %v1981_v0 = vpop.f32.mrf.mxu0 }
 0x823   :  { %2194 = vtanh.f32 %v671_v62  ;;  %v1797_v42 = vmul.f32 -1.442695, %v671_v62 }
 0x824   :  { %v668_v4 = vpop.f32.mrf.mxu0 }
 0x826   :  { %v1982_v6 = vpop.f32.mrf.mxu0 }
 0x830   :  { %v2195_v11 = vpop.eup %2194 }
 0x831   :  { %v738_v12 = vpop.f32.mrf.mxu1  ;;  %681 = vrot.lane.b32.xlu0 %v2195_v11, %s2391_s4 }
 0x832   :  { %v739_v14 = vadd.f32 %v2628_v18, %v738_v12 }
 0x833   :  { %v1993_v15 = vpop.f32.mrf.mxu1 }
 0x834   :  { %2196 = vtanh.f32 %v739_v14  ;;  %v1799_v21 = vmul.f32 -1.442695, %v739_v14 }
 0x835   :  { %v741_v16 = vpop.f32.mrf.mxu1  ;;  %2198 = vpow2.f32 %v1797_v42 }
 0x836   :  { %2200 = vpow2.f32 %v1799_v21 }
 0x837   :  { %v1994_v17 = vpop.f32.mrf.mxu1 }
 0x841   :  { %v2197_v19 = vpop.eup %2196 }
 0x842   :  { %753 = vrot.lane.b32.xlu1 %v2197_v19, %s2391_s4  ;;  %v2199_v20 = vpop.eup %2198 }
 0x843   :  { %v675_v22 = vadd.f32 1.0, %v2199_v20  ;;  %v2201_v23 = vpop.eup %2200 }
 0x844   :  { %v747_v25 = vadd.f32 1.0, %v2201_v23 }
 0x845   :  { %2202 = vrcp.f32 %v675_v22 }
 0x846   :  { %2204 = vrcp.f32 %v747_v25 }
 0x852   :  { %v2203_v24 = vpop.eup %2202 }
 0x853   :  { %v2205_v28 = vpop.eup %2204  ;;  %v679_v31 = vmul.f32 %v2203_v24, %v2636_v40 }
 0x854   :  { %v751_v35 = vmul.f32 %v2205_v28, %v2639_v46 }
 0x8a3   :  { %v682_v26 = vpop.permute.xlu0 %681 }
 0x8a4   :  { %v684_v27 = vmul.f32 %v2203_v24, %v682_v26 }
 0x8a6   :  { %686 = vrot.lane.b32.xlu0 %v684_v27, %s2402_s2 }
 0x8b4   :  { %v754_v29 = vpop.permute.xlu1 %753 }
 0x8b5   :  { %v756_v30 = vmul.f32 %v2205_v28, %v754_v29 }
 0x8b7   :  { %758 = vrot.lane.b32.xlu1 %v756_v30, %s2402_s2 }
 0x918   :  { %v687_v32 = vpop.permute.xlu0 %686 }
 0x919   :  { %v2669_v33 = vadd.f32 %v687_v32, %v679_v31 }
 0x91b   :  { %2206 = vtanh.f32 %v2669_v33 }
 0x928   :  { %v2207_v34 = vpop.eup %2206 }
 0x929   :  { %v759_v36 = vpop.permute.xlu1 %758  ;;  %692 = vrot.lane.b32.xlu0 %v2207_v34, %s2391_s4 }
 0x92a   :  { %v2674_v37 = vadd.f32 %v759_v36, %v751_v35 }
 0x92c   :  { %2208 = vtanh.f32 %v2674_v37 }
 0x939   :  { %v2209_v38 = vpop.eup %2208 }
 0x93a   :  { %764 = vrot.lane.b32.xlu1 %v2209_v38, %s2391_s4 }
 0x99b   :  { %v693_v39 = vpop.permute.xlu0 %692 }
 0x99c   :  { %v695_v40 = vmul.f32 %v2203_v24, %v693_v39 }
 0x99e   :  { %v696_v41 = vpack.c.bf16 %v695_v40, %v695_v40  ;;  %v402_v40 = vadd.f32 %v2540_v43, %v2621_v8 }
 0x9a0   :  { %770 = vrot.lane.b32.xlu0 %v696_v41, %s2402_s2 }
 0x9ac   :  { %v765_v44 = vpop.permute.xlu1 %764 }
 0x9ad   :  { %v767_v45 = vmul.f32 %v2205_v28, %v765_v44 }
 0x9af   :  { %v768_v47 = vpack.c.bf16 %v767_v45, %v767_v45 }
 0x9b1   :  { %842 = vrot.lane.b32.xlu1 %v768_v47, %s2391_s4 }
 0xa12   :  { %v771_v46 = vpop.permute.xlu0 %770 }
 0xa13   :  { %2000 = vmatmul.mubr.msk.bf16.vlgmr.msra.gmra.mxu0 %vm338_vm12, %v771_v46 }
 0xa14   :  { %2004 = vmatpush3.bf16.msra.mxu0 %v2577_v63  ;;  %2011 = vmatprep.mubr.msk.bf16.mxu0 %vm2404_vm13, %v2403_v57 }
 0xa15   :  { %2005 = vmatprep.subr.bf16.mxu0 %v2403_v57 }
 0xa18   :  { %2006 = vmatpush3.bf16.msra.mxu0 %v2584_v1 }
 0xa19   :  { %2007 = vmatprep.subr.bf16.mxu0 %v2403_v57 }
 0xa1c   :  { %2008 = vmatpush3.bf16.msra.mxu0 %v2593_v2 }
 0xa1d   :  { %2009 = vmatprep.subr.bf16.mxu0 %v2403_v57 }
 0xa20   :  { %2010 = vmatpush3.bf16.msra.mxu0 %v2600_v3 }
 0xa21   :  { %2035 = vmatprep.subr.bf16.mxu0 %v2403_v57 }
 0xa23   :  { %v843_v48 = vpop.permute.xlu1 %842 }
 0xa24   :  { %v845_v49 = vsel %vm338_vm12, %v771_v46, %v843_v48 }
 0xa25   :  { %2012 = vmatmul.mubr.msk.bf16.vlgmr.msra.gmra.mxu0 %vm557_vm14, %v845_v49 }
 0xa26   :  { %2036 = vmatpush3.bf16.msra.mxu0 %v2551_v56  ;;  %2039 = vmatprep.mubr.msk.bf16.mxu0 %vm2404_vm13, %v2403_v57 }
 0xa27   :  { %2037 = vmatprep.subr.bf16.mxu0 %v2403_v57 }
 0xa2a   :  { %2038 = vmatpush3.bf16.msra.mxu0 %v2560_v58 }
 0xa2b   :  { %2043 = vmatprep.subr.bf16.mxu0 %v2403_v57 }
 0xad3   :  { %v809_v51 = vpop.f32.mrf.mxu0 }
 0xad4   :  { %v815_v52 = vadd.f32 %v809_v51, %v397_v50 }
 0xad5   :  { %v2001_v53 = vpop.f32.mrf.mxu0 }
 0xad6   :  { %2210 = vtanh.f32 %v815_v52  ;;  %v1801_v5 = vmul.f32 -1.442695, %v815_v52 }
 0xad7   :  { %v812_v54 = vpop.f32.mrf.mxu0 }
 0xad9   :  { %v2002_v55 = vpop.f32.mrf.mxu0 }
 0xae3   :  { %v2211_v59 = vpop.eup %2210 }
 0xae4   :  { %825 = vrot.lane.b32.xlu0 %v2211_v59, %s2391_s4 }
 0xae5   :  { %v882_v60 = vpop.f32.mrf.mxu0 }
 0xae6   :  { %v883_v61 = vadd.f32 %v2628_v18, %v882_v60 }
 0xae7   :  { %v2013_v62 = vpop.f32.mrf.mxu0 }
 0xae8   :  { %2212 = vtanh.f32 %v883_v61  ;;  %v1803_v12 = vmul.f32 -1.442695, %v883_v61 }
 0xae9   :  { %v885_v0 = vpop.f32.mrf.mxu0  ;;  %2214 = vpow2.f32 %v1801_v5 }
 0xaea   :  { %2216 = vpow2.f32 %v1803_v12 }
 0xaeb   :  { %v2014_v4 = vpop.f32.mrf.mxu0 }
 0xaf5   :  { %v2213_v6 = vpop.eup %2212 }
 0xaf6   :  { %897 = vrot.lane.b32.xlu1 %v2213_v6, %s2391_s4  ;;  %v2215_v11 = vpop.eup %2214 }
 0xaf7   :  { %v819_v14 = vadd.f32 1.0, %v2215_v11  ;;  %v2217_v15 = vpop.eup %2216 }
 0xaf8   :  { %v891_v42 = vadd.f32 1.0, %v2217_v15 }
 0xaf9   :  { %2218 = vrcp.f32 %v819_v14 }
 0xafa   :  { %2220 = vrcp.f32 %v891_v42 }
 0xb06   :  { %v2219_v16 = vpop.eup %2218 }
 0xb07   :  { %v2221_v20 = vpop.eup %2220  ;;  %v823_v23 = vmul.f32 %v2219_v16, %v2669_v33 }
 0xb08   :  { %v895_v27 = vmul.f32 %v2221_v20, %v2674_v37 }
 0xb56   :  { %v826_v17 = vpop.permute.xlu0 %825 }
 0xb57   :  { %v828_v19 = vmul.f32 %v2219_v16, %v826_v17 }
 0xb59   :  { %830 = vrot.lane.b32.xlu0 %v828_v19, %s2402_s2 }
 0xb68   :  { %v898_v21 = vpop.permute.xlu1 %897 }
 0xb69   :  { %v900_v22 = vmul.f32 %v2221_v20, %v898_v21 }
 0xb6b   :  { %902 = vrot.lane.b32.xlu1 %v900_v22, %s2402_s2 }
 0xbcb   :  { %v831_v24 = vpop.permute.xlu0 %830 }
 0xbcc   :  { %v2707_v25 = vadd.f32 %v831_v24, %v823_v23 }
 0xbce   :  { %2222 = vtanh.f32 %v2707_v25 }
 0xbdb   :  { %v2223_v26 = vpop.eup %2222 }
 0xbdc   :  { %836 = vrot.lane.b32.xlu0 %v2223_v26, %s2391_s4 }
 0xbdd   :  { %v903_v28 = vpop.permute.xlu1 %902 }
 0xbde   :  { %v2712_v29 = vadd.f32 %v903_v28, %v895_v27 }
 0xbe0   :  { %2224 = vtanh.f32 %v2712_v29 }
 0xbed   :  { %v2225_v30 = vpop.eup %2224 }
 0xbee   :  { %908 = vrot.lane.b32.xlu1 %v2225_v30, %s2391_s4 }
 0xc4e   :  { %v837_v31 = vpop.permute.xlu0 %836 }
 0xc4f   :  { %v839_v32 = vmul.f32 %v2219_v16, %v837_v31  ;;  %v405_v31 = vadd.f32 %v2540_v43, %v2625_v10 }
 0xc51   :  { %v840_v33 = vpack.c.bf16 %v839_v32, %v839_v32 }
 0xc53   :  { %914 = vrot.lane.b32.xlu0 %v840_v33, %s2402_s2 }
 0xc60   :  { %v909_v34 = vpop.permute.xlu1 %908 }
 0xc61   :  { %v911_v35 = vmul.f32 %v2221_v20, %v909_v34 }
 0xc63   :  { %v912_v36 = vpack.c.bf16 %v911_v35, %v911_v35 }
 0xc65   :  { %986 = vrot.lane.b32.xlu1 %v912_v36, %s2391_s4 }
 0xcc5   :  { %v915_v38 = vpop.permute.xlu0 %914 }
 0xcc6   :  { %2020 = vmatmul.mubr.msk.bf16.vlgmr.msra.gmra.mxu1 %vm338_vm12, %v915_v38 }
 0xcc7   :  { %2024 = vmatpush3.bf16.msra.mxu1 %v2577_v63  ;;  %2031 = vmatprep.mubr.msk.bf16.mxu1 %vm2404_vm13, %v2403_v57 }
 0xcc8   :  { %2025 = vmatprep.subr.bf16.mxu1 %v2403_v57 }
 0xccb   :  { %2026 = vmatpush3.bf16.msra.mxu1 %v2584_v1 }
 0xccc   :  { %2027 = vmatprep.subr.bf16.mxu1 %v2403_v57 }
 0xccf   :  { %2028 = vmatpush3.bf16.msra.mxu1 %v2593_v2 }
 0xcd0   :  { %2029 = vmatprep.subr.bf16.mxu1 %v2403_v57 }
 0xcd3   :  { %2030 = vmatpush3.bf16.msra.mxu1 %v2600_v3 }
 0xcd4   :  { %2055 = vmatprep.subr.bf16.mxu1 %v2403_v57 }
 0xcd7   :  { %v987_v37 = vpop.permute.xlu1 %986 }
 0xcd8   :  { %v989_v39 = vsel %vm338_vm12, %v915_v38, %v987_v37 }
 0xcd9   :  { %2032 = vmatmul.mubr.msk.bf16.vlgmr.msra.gmra.mxu1 %vm557_vm14, %v989_v39 }
 0xcda   :  { %2056 = vmatpush3.bf16.msra.mxu1 %v2551_v56  ;;  %2059 = vmatprep.mubr.msk.bf16.mxu1 %vm2404_vm13, %v2403_v57 }
 0xcdb   :  { %2057 = vmatprep.subr.bf16.mxu1 %v2403_v57 }
 0xcde   :  { %2058 = vmatpush3.bf16.msra.mxu1 %v2560_v58 }
 0xcdf   :  { %2063 = vmatprep.subr.bf16.mxu1 %v2403_v57 }
 0xd86   :  { %v953_v41 = vpop.f32.mrf.mxu1 }
 0xd87   :  { %v959_v44 = vadd.f32 %v953_v41, %v402_v40 }
 0xd88   :  { %v2021_v45 = vpop.f32.mrf.mxu1 }
 0xd89   :  { %2226 = vtanh.f32 %v959_v44  ;;  %v1805_v8 = vmul.f32 -1.442695, %v959_v44 }
 0xd8a   :  { %v956_v47 = vpop.f32.mrf.mxu1 }
 0xd8c   :  { %v2022_v46 = vpop.f32.mrf.mxu1 }
 0xd96   :  { %v2227_v48 = vpop.eup %2226 }
 0xd97   :  { %969 = vrot.lane.b32.xlu0 %v2227_v48, %s2391_s4 }
 0xd99   :  { %v1026_v49 = vpop.f32.mrf.mxu1 }
 0xd9a   :  { %v1027_v50 = vadd.f32 %v2628_v18, %v1026_v49 }
 0xd9b   :  { %v2033_v51 = vpop.f32.mrf.mxu1 }
 0xd9c   :  { %2228 = vtanh.f32 %v1027_v50  ;;  %v1807_v60 = vmul.f32 -1.442695, %v1027_v50 }
 0xd9d   :  { %v1029_v52 = vpop.f32.mrf.mxu1  ;;  %2230 = vpow2.f32 %v1805_v8 }
 0xd9f   :  { %v2034_v53 = vpop.f32.mrf.mxu1 }
 0xda9   :  { %v2229_v54 = vpop.eup %2228 }
 0xdaa   :  { %1041 = vrot.lane.b32.xlu1 %v2229_v54, %s2391_s4  ;;  %v2231_v55 = vpop.eup %2230 }
 0xdab   :  { %v963_v59 = vadd.f32 1.0, %v2231_v55 }
 0xdad   :  { %2232 = vrcp.f32 %v963_v59 }
 0xdae   :  { %2234 = vpow2.f32 %v1807_v60 }
 0xdba   :  { %v2233_v61 = vpop.eup %2232 }
 0xdbb   :  { %v2235_v62 = vpop.eup %2234  ;;  %v967_v14 = vmul.f32 %v2233_v61, %v2707_v25 }
 0xdbc   :  { %v1035_v6 = vadd.f32 1.0, %v2235_v62 }
 0xdbe   :  { %2236 = vrcp.f32 %v1035_v6 }
 0xdcb   :  { %v2237_v5 = vpop.eup %2236 }
 0xdcc   :  { %v1039_v19 = vmul.f32 %v2237_v5, %v2712_v29 }
 0xe09   :  { %v970_v0 = vpop.permute.xlu0 %969 }
 0xe0a   :  { %v972_v4 = vmul.f32 %v2233_v61, %v970_v0 }
 0xe0c   :  { %974 = vrot.lane.b32.xlu0 %v972_v4, %s2402_s2 }
 0xe1c   :  { %v1042_v11 = vpop.permute.xlu1 %1041 }
 0xe1d   :  { %v1044_v12 = vmul.f32 %v2237_v5, %v1042_v11 }
 0xe1f   :  { %1046 = vrot.lane.b32.xlu1 %v1044_v12, %s2402_s2 }
 0xe7e   :  { %v975_v15 = vpop.permute.xlu0 %974 }
 0xe7f   :  { %v2745_v16 = vadd.f32 %v975_v15, %v967_v14 }
 0xe81   :  { %2238 = vtanh.f32 %v2745_v16 }
 0xe8e   :  { %v2239_v17 = vpop.eup %2238 }
 0xe8f   :  { %980 = vrot.lane.b32.xlu0 %v2239_v17, %s2391_s4 }
 0xe91   :  { %v1047_v42 = vpop.permute.xlu1 %1046 }
 0xe92   :  { %v2750_v20 = vadd.f32 %v1047_v42, %v1039_v19  ;;  %v410_v42 = vadd.f32 %v2619_v7, %v2540_v43 }
 0xe94   :  { %2240 = vtanh.f32 %v2750_v20 }
 0xea1   :  { %v2241_v21 = vpop.eup %2240 }
 0xea2   :  { %1052 = vrot.lane.b32.xlu1 %v2241_v21, %s2391_s4 }
 0xf01   :  { %v981_v22 = vpop.permute.xlu0 %980 }
 0xf02   :  { %v983_v23 = vmul.f32 %v2233_v61, %v981_v22 }
 0xf04   :  { %v984_v24 = vpack.c.bf16 %v983_v23, %v983_v23 }
 0xf06   :  { %1058 = vrot.lane.b32.xlu0 %v984_v24, %s2402_s2 }
 0xf14   :  { %v1053_v25 = vpop.permute.xlu1 %1052 }
 0xf15   :  { %v1055_v26 = vmul.f32 %v2237_v5, %v1053_v25 }
 0xf17   :  { %v1056_v27 = vpack.c.bf16 %v1055_v26, %v1055_v26 }
 0xf19   :  { %1130 = vrot.lane.b32.xlu1 %v1056_v27, %s2391_s4 }
 0xf78   :  { %v1059_v28 = vpop.permute.xlu0 %1058 }
 0xf79   :  { %2040 = vmatmul.mubr.msk.bf16.vlgmr.msra.gmra.mxu0 %vm338_vm12, %v1059_v28 }
 0xf7a   :  { %2044 = vmatpush3.bf16.msra.mxu0 %v2577_v63  ;;  %2051 = vmatprep.mubr.msk.bf16.mxu0 %vm2404_vm13, %v2403_v57 }
 0xf7b   :  { %2045 = vmatprep.subr.bf16.mxu0 %v2403_v57 }
 0xf7e   :  { %2046 = vmatpush3.bf16.msra.mxu0 %v2584_v1 }
 0xf7f   :  { %2047 = vmatprep.subr.bf16.mxu0 %v2403_v57 }
 0xf82   :  { %2048 = vmatpush3.bf16.msra.mxu0 %v2593_v2 }
 0xf83   :  { %2049 = vmatprep.subr.bf16.mxu0 %v2403_v57 }
 0xf86   :  { %2050 = vmatpush3.bf16.msra.mxu0 %v2600_v3 }
 0xf87   :  { %2075 = vmatprep.subr.bf16.mxu0 %v2403_v57 }
 0xf8b   :  { %v1131_v29 = vpop.permute.xlu1 %1130 }
 0xf8c   :  { %v1133_v30 = vsel %vm338_vm12, %v1059_v28, %v1131_v29 }
 0xf8d   :  { %2052 = vmatmul.mubr.msk.bf16.vlgmr.msra.gmra.mxu0 %vm557_vm14, %v1133_v30 }
 0xf8e   :  { %2076 = vmatpush3.bf16.msra.mxu0 %v2551_v56  ;;  %2079 = vmatprep.mubr.msk.bf16.mxu0 %vm2404_vm13, %v2403_v57 }
 0xf8f   :  { %2077 = vmatprep.subr.bf16.mxu0 %v2403_v57 }
 0xf92   :  { %2078 = vmatpush3.bf16.msra.mxu0 %v2560_v58 }
 0xf93   :  { %2083 = vmatprep.subr.bf16.mxu0 %v2403_v57 }
0x1039   :  { %v1097_v32 = vpop.f32.mrf.mxu0 }
0x103a   :  { %v1103_v33 = vadd.f32 %v1097_v32, %v405_v31 }
0x103b   :  { %v2041_v34 = vpop.f32.mrf.mxu0 }
0x103c   :  { %2242 = vtanh.f32 %v1103_v33  ;;  %v1809_v10 = vmul.f32 -1.442695, %v1103_v33 }
0x103d   :  { %v1100_v35 = vpop.f32.mrf.mxu0 }
0x103f   :  { %v2042_v36 = vpop.f32.mrf.mxu0 }
0x1049   :  { %v2243_v38 = vpop.eup %2242 }
0x104a   :  { %1113 = vrot.lane.b32.xlu0 %v2243_v38, %s2391_s4 }
0x104d   :  { %v1170_v56 = vpop.f32.mrf.mxu0 }
0x104e   :  { %v1171_v37 = vadd.f32 %v2628_v18, %v1170_v56 }
0x104f   :  { %v2053_v39 = vpop.f32.mrf.mxu0 }
0x1050   :  { %2244 = vtanh.f32 %v1171_v37  ;;  %v1811_v47 = vmul.f32 -1.442695, %v1171_v37 }
0x1051   :  { %v1173_v58 = vpop.f32.mrf.mxu0  ;;  %2246 = vpow2.f32 %v1809_v10 }
0x1053   :  { %v2054_v40 = vpop.f32.mrf.mxu0 }
0x105d   :  { %v2245_v41 = vpop.eup %2244 }
0x105e   :  { %1185 = vrot.lane.b32.xlu1 %v2245_v41, %s2391_s4  ;;  %v2247_v44 = vpop.eup %2246 }
0x105f   :  { %v1107_v45 = vadd.f32 1.0, %v2247_v44 }
0x1061   :  { %2248 = vrcp.f32 %v1107_v45 }
0x1062   :  { %2250 = vpow2.f32 %v1811_v47 }
0x106e   :  { %v2249_v46 = vpop.eup %2248 }
0x106f   :  { %v2251_v49 = vpop.eup %2250  ;;  %v1111_v8 = vmul.f32 %v2249_v46, %v2745_v16 }
0x1070   :  { %v1179_v51 = vadd.f32 1.0, %v2251_v49 }
0x1072   :  { %2252 = vrcp.f32 %v1179_v51 }
0x107f   :  { %v2253_v52 = vpop.eup %2252 }
0x1080   :  { %v1183_v61 = vmul.f32 %v2253_v52, %v2750_v20 }
0x10bc   :  { %v1114_v48 = vpop.permute.xlu0 %1113 }
0x10bd   :  { %v1116_v50 = vmul.f32 %v2249_v46, %v1114_v48 }
0x10bf   :  { %1118 = vrot.lane.b32.xlu0 %v1116_v50, %s2402_s2 }
0x10d0   :  { %v1186_v53 = vpop.permute.xlu1 %1185 }
0x10d1   :  { %v1188_v54 = vmul.f32 %v2253_v52, %v1186_v53 }
0x10d3   :  { %1190 = vrot.lane.b32.xlu1 %v1188_v54, %s2402_s2 }
0x1131   :  { %v1119_v55 = vpop.permute.xlu0 %1118 }
0x1132   :  { %v2783_v59 = vadd.f32 %v1119_v55, %v1111_v8 }
0x1134   :  { %2254 = vtanh.f32 %v2783_v59 }
0x1141   :  { %v2255_v60 = vpop.eup %2254 }
0x1142   :  { %1124 = vrot.lane.b32.xlu0 %v2255_v60, %s2391_s4 }
0x1145   :  { %v1191_v62 = vpop.permute.xlu1 %1190 }
0x1146   :  { %v2788_v0 = vadd.f32 %v1191_v62, %v1183_v61 }
0x1148   :  { %2256 = vtanh.f32 %v2788_v0 }
0x1155   :  { %v2257_v4 = vpop.eup %2256 }
0x1156   :  { %1196 = vrot.lane.b32.xlu1 %v2257_v4, %s2391_s4 }
0x11b4   :  { %v1125_v6 = vpop.permute.xlu0 %1124 }
0x11b5   :  { %v1127_v5 = vmul.f32 %v2249_v46, %v1125_v6 }
0x11b7   :  { %v1128_v11 = vpack.c.bf16 %v1127_v5, %v1127_v5 }
0x11b9   :  { %1202 = vrot.lane.b32.xlu0 %v1128_v11, %s2402_s2 }
0x11c8   :  { %v1197_v12 = vpop.permute.xlu1 %1196 }
0x11c9   :  { %v1199_v14 = vmul.f32 %v2253_v52, %v1197_v12 }
0x11cb   :  { %v1200_v15 = vpack.c.bf16 %v1199_v14, %v1199_v14 }
0x11cd   :  { %1274 = vrot.lane.b32.xlu1 %v1200_v15, %s2391_s4 }
0x122b   :  { %v1203_v16 = vpop.permute.xlu0 %1202 }
0x122c   :  { %2060 = vmatmul.mubr.msk.bf16.vlgmr.msra.gmra.mxu1 %vm338_vm12, %v1203_v16 }
0x122d   :  { %2064 = vmatpush3.bf16.msra.mxu1 %v2577_v63  ;;  %2071 = vmatprep.mubr.msk.bf16.mxu1 %vm2404_vm13, %v2403_v57 }
0x122e   :  { %2065 = vmatprep.subr.bf16.mxu1 %v2403_v57 }
0x1231   :  { %2066 = vmatpush3.bf16.msra.mxu1 %v2584_v1 }
0x1232   :  { %2067 = vmatprep.subr.bf16.mxu1 %v2403_v57 }
0x1235   :  { %2068 = vmatpush3.bf16.msra.mxu1 %v2593_v2 }
0x1236   :  { %2069 = vmatprep.subr.bf16.mxu1 %v2403_v57 }
0x1239   :  { %2070 = vmatpush3.bf16.msra.mxu1 %v2600_v3 }
0x123a   :  { %2095 = vmatprep.subr.bf16.mxu1 %v2403_v57 }
0x123f   :  { %v1275_v17 = vpop.permute.xlu1 %1274 }
0x1240   :  { %v1277_v19 = vsel %vm338_vm12, %v1203_v16, %v1275_v17 }
0x1241   :  { %2072 = vmatmul.mubr.msk.bf16.vlgmr.msra.gmra.mxu1 %vm557_vm14, %v1277_v19 }
0x1242   :  { %2096 = vmatpush3.bf16.msra.mxu1 %v2577_v63  ;;  %2103 = vmatprep.mubr.msk.bf16.mxu1 %vm2404_vm13, %v2403_v57 }
0x1243   :  { %2097 = vmatprep.subr.bf16.mxu1 %v2403_v57 }
0x1246   :  { %2098 = vmatpush3.bf16.msra.mxu1 %v2584_v1 }
0x1247   :  { %2099 = vmatprep.subr.bf16.mxu1 %v2403_v57 }
0x124a   :  { %2100 = vmatpush3.bf16.msra.mxu1 %v2593_v2 }
0x124b   :  { %2101 = vmatprep.subr.bf16.mxu1 %v2403_v57 }
0x124e   :  { %2102 = vmatpush3.bf16.msra.mxu1 %v2600_v3 }
0x124f   :  { %2115 = vmatprep.subr.bf16.mxu1 %v2403_v57 }
0x12ec   :  { %v1241_v20 = vpop.f32.mrf.mxu1 }
0x12ed   :  { %v1247_v21 = vadd.f32 %v1241_v20, %v410_v42 }
0x12ee   :  { %v2061_v22 = vpop.f32.mrf.mxu1 }
0x12ef   :  { %2258 = vtanh.f32 %v1247_v21  ;;  %v1813_v43 = vmul.f32 -1.442695, %v1247_v21 }
0x12f0   :  { %v1244_v23 = vpop.f32.mrf.mxu1 }
0x12f2   :  { %v2062_v24 = vpop.f32.mrf.mxu1 }
0x12fc   :  { %v2259_v25 = vpop.eup %2258 }
0x12fd   :  { %1257 = vrot.lane.b32.xlu0 %v2259_v25, %s2391_s4 }
0x1301   :  { %v1314_v26 = vpop.f32.mrf.mxu1 }
0x1302   :  { %v1315_v27 = vadd.f32 %v2628_v18, %v1314_v26 }
0x1303   :  { %v2073_v28 = vpop.f32.mrf.mxu1 }
0x1304   :  { %2260 = vtanh.f32 %v1315_v27  ;;  %v1815_v33 = vmul.f32 -1.442695, %v1315_v27 }
0x1305   :  { %v1317_v29 = vpop.f32.mrf.mxu1  ;;  %2262 = vpow2.f32 %v1813_v43 }
0x1307   :  { %v2074_v30 = vpop.f32.mrf.mxu1 }
0x1311   :  { %v2261_v31 = vpop.eup %2260 }
0x1312   :  { %1329 = vrot.lane.b32.xlu1 %v2261_v31, %s2391_s4  ;;  %v2263_v7 = vpop.eup %2262 }
0x1313   :  { %v1251_v32 = vadd.f32 1.0, %v2263_v7 }
0x1315   :  { %2264 = vrcp.f32 %v1251_v32 }
0x1316   :  { %2266 = vpow2.f32 %v1815_v33 }
0x1322   :  { %v2265_v34 = vpop.eup %2264 }
0x1323   :  { %v2267_v38 = vpop.eup %2266  ;;  %v1255_v40 = vmul.f32 %v2265_v34, %v2783_v59  ;;  %v2300_v59 = vld [vmem:[#allocation2] ss:$0 sm:$0xff] }
0x1324   :  { %v1323_v56 = vadd.f32 1.0, %v2267_v38 }
0x1326   :  { %2268 = vrcp.f32 %v1323_v56 }
0x1333   :  { %v2269_v37 = vpop.eup %2268 }
0x1334   :  { %v1327_v45 = vmul.f32 %v2269_v37, %v2788_v0 }
0x136f   :  { %v1258_v35 = vpop.permute.xlu0 %1257 }
0x1370   :  { %v1260_v36 = vmul.f32 %v2265_v34, %v1258_v35 }
0x1372   :  { %1262 = vrot.lane.b32.xlu0 %v1260_v36, %s2402_s2 }
0x1384   :  { %v1330_v39 = vpop.permute.xlu1 %1329 }
0x1385   :  { %v1332_v58 = vmul.f32 %v2269_v37, %v1330_v39 }
0x1387   :  { %1334 = vrot.lane.b32.xlu1 %v1332_v58, %s2402_s2 }
0x13e4   :  { %v1263_v41 = vpop.permute.xlu0 %1262 }
0x13e5   :  { %v2825_v10 = vadd.f32 %v1263_v41, %v1255_v40 }
0x13e7   :  { %2270 = vtanh.f32 %v2825_v10 }
0x13f4   :  { %v2271_v44 = vpop.eup %2270 }
0x13f5   :  { %1268 = vrot.lane.b32.xlu0 %v2271_v44, %s2391_s4 }
0x13f9   :  { %v1335_v47 = vpop.permute.xlu1 %1334 }
0x13fa   :  { %v2830_v46 = vadd.f32 %v1335_v47, %v1327_v45 }
0x13fc   :  { %2272 = vtanh.f32 %v2830_v46 }
0x1409   :  { %v2273_v48 = vpop.eup %2272 }
0x140a   :  { %1340 = vrot.lane.b32.xlu1 %v2273_v48, %s2391_s4 }
0x1467   :  { %v1269_v49 = vpop.permute.xlu0 %1268 }
0x1468   :  { %v1271_v50 = vmul.f32 %v2265_v34, %v1269_v49  ;;  %v1565_v49 = vld [vmem:[%s2919_s10] sm:$0x1]  ;;  %s2405_s10 = smov 96  }
0x146a   :  { %v1272_v51 = vpack.c.bf16 %v1271_v50, %v1271_v50  ;;  %v1566_v50 = vadd.f32 1e-05, %v1565_v49 }
0x146c   :  { %1346 = vrot.lane.b32.xlu0 %v1272_v51, %s2402_s2 }
0x147c   :  { %v1341_v52 = vpop.permute.xlu1 %1340 }
0x147d   :  { %v1343_v53 = vmul.f32 %v2269_v37, %v1341_v52 }
0x147f   :  { %v1344_v54 = vpack.c.bf16 %v1343_v53, %v1343_v53 }
0x1481   :  { %1418 = vrot.lane.b32.xlu1 %v1344_v54, %s2391_s4  ;;  %v1564_v54 = vld [vmem:[%s2916_s7] sm:$0x1] }
0x14de   :  { %v1347_v8 = vpop.permute.xlu0 %1346 }
0x14df   :  { %2080 = vmatmul.mubr.msk.bf16.vlgmr.msra.gmra.mxu0 %vm338_vm12, %v1347_v8 }
0x14e0   :  { %2084 = vmatpush3.bf16.msra.mxu0 %v2577_v63  ;;  %2091 = vmatprep.mubr.msk.bf16.mxu0 %vm2404_vm13, %v2403_v57 }
0x14e1   :  { %2085 = vmatprep.subr.bf16.mxu0 %v2403_v57 }
0x14e4   :  { %2086 = vmatpush3.bf16.msra.mxu0 %v2584_v1  ;;  %v413_v1 = vadd.f32 %v2300_v59, %v2623_v9 }
0x14e5   :  { %2087 = vmatprep.subr.bf16.mxu0 %v2403_v57 }
0x14e8   :  { %2088 = vmatpush3.bf16.msra.mxu0 %v2593_v2 }
0x14e9   :  { %2089 = vmatprep.subr.bf16.mxu0 %v2403_v57 }
0x14ec   :  { %2090 = vmatpush3.bf16.msra.mxu0 %v2600_v3 }
0x14ed   :  { %2107 = vmatprep.subr.bf16.mxu0 %v2403_v57 }
0x14f3   :  { %v1419_v55 = vpop.permute.xlu1 %1418 }
0x14f4   :  { %v1421_v63 = vsel %vm338_vm12, %v1347_v8, %v1419_v55  ;;  %v1575_v55 = vshrl.u32 %v128_v13, 7  ;;  %v2165_v13 = vld [vmem:[#allocation7] sm:$0xff]  }
0x14f5   :  { %2092 = vmatmul.mubr.msk.bf16.vlgmr.msra.gmra.mxu0 %vm557_vm14, %v1421_v63  ;;  %v1570_v63 = vld [vmem:[%s2918_s9] sm:$0x1] }
0x14f6   :  { %2111 = vmatprep.mubr.msk.bf16.mxu0 %vm2404_vm13, %v2403_v57  ;;  %v1576_v59 = vsub.s32 0, %v1575_v55 }
0x159f   :  { %v1385_v60 = vpop.f32.mrf.mxu0 }
0x15a0   :  { %v1391_v61 = vadd.f32 %v1385_v60, %v413_v1  ;;  %v1569_v60 = vld [vmem:[#allocation6] sm:$0x1] }
0x15a1   :  { %v2081_v2 = vpop.f32.mrf.mxu0 }
0x15a2   :  { %2274 = vtanh.f32 %v1391_v61  ;;  %v1817_v9 = vmul.f32 -1.442695, %v1391_v61 }
0x15a3   :  { %v1388_v62 = vpop.f32.mrf.mxu0 }
0x15a5   :  { %v2082_v0 = vpop.f32.mrf.mxu0 }
0x15af   :  { %v2275_v3 = vpop.eup %2274 }
0x15b0   :  { %1401 = vrot.lane.b32.xlu0 %v2275_v3, %s2391_s4 }
0x15b5   :  { %v1458_v4 = vpop.f32.mrf.mxu0 }
0x15b6   :  { %v1459_v6 = vadd.f32 %v2628_v18, %v1458_v4 }
0x15b7   :  { %v2093_v5 = vpop.f32.mrf.mxu0 }
0x15b8   :  { %2276 = vtanh.f32 %v1459_v6  ;;  %v1819_v17 = vmul.f32 -1.442695, %v1459_v6  ;;  %v2164_v6 = vld [vmem:[#allocation7 + $0x8] sm:$0xff]  }
0x15b9   :  { %v1461_v11 = vpop.f32.mrf.mxu0  ;;  %2278 = vpow2.f32 %v1817_v9  ;;  %2108 = vmatpush3.bf16.msra.mxu0 %v2164_v6 }
0x15ba   :  { %2109 = vmatprep.subr.bf16.mxu0 %v2403_v57  ;;  %v2166_v11 = vld [vmem:[%s2922_s13 + $0x18] sm:$0xff]  }
0x15bb   :  { %v2094_v12 = vpop.f32.mrf.mxu0 }
0x15bc   :  { %v2167_v12 = vld [vmem:[%s2922_s13 + $0x10] sm:$0xff]  }
0x15bd   :  { %2110 = vmatpush3.bf16.msra.mxu0 %v2165_v13 }
0x15c5   :  { %v2277_v14 = vpop.eup %2276 }
0x15c6   :  { %1473 = vrot.lane.b32.xlu1 %v2277_v14, %s2391_s4  ;;  %v2279_v15 = vpop.eup %2278 }
0x15c7   :  { %v1395_v16 = vadd.f32 1.0, %v2279_v15 }
0x15c9   :  { %2280 = vrcp.f32 %v1395_v16 }
0x15ca   :  { %2282 = vpow2.f32 %v1819_v17 }
0x15d6   :  { %v2281_v19 = vpop.eup %2280 }
0x15d7   :  { %v2283_v21 = vpop.eup %2282  ;;  %v1399_v26 = vmul.f32 %v2281_v19, %v2825_v10 }
0x15d8   :  { %v1467_v22 = vadd.f32 1.0, %v2283_v21  ;;  %v2168_v21 = vld [vmem:[%s2922_s13 + $0x8] sm:$0xff]  }
0x15da   :  { %2284 = vrcp.f32 %v1467_v22  ;;  %v2169_v22 = vld [vmem:[%s2922_s13] sm:$0xff]  }
0x15e7   :  { %v2285_v23 = vpop.eup %2284 }
0x15e8   :  { %v1471_v30 = vmul.f32 %v2285_v23, %v2830_v46 }
0x1622   :  { %v1402_v42 = vpop.permute.xlu0 %1401 }
0x1623   :  { %v1404_v20 = vmul.f32 %v2281_v19, %v1402_v42 }
0x1625   :  { %1406 = vrot.lane.b32.xlu0 %v1404_v20, %s2402_s2 }
0x1638   :  { %v1474_v24 = vpop.permute.xlu1 %1473 }
0x1639   :  { %v1476_v25 = vmul.f32 %v2285_v23, %v1474_v24 }
0x163b   :  { %1478 = vrot.lane.b32.xlu1 %v1476_v25, %s2402_s2 }
0x1697   :  { %v1407_v27 = vpop.permute.xlu0 %1406 }
0x1698   :  { %v1409_v28 = vadd.f32 %v1407_v27, %v1399_v26 }
0x169a   :  { %2286 = vtanh.f32 %v1409_v28 }
0x16a7   :  { %v2287_v29 = vpop.eup %2286 }
0x16a8   :  { %1412 = vrot.lane.b32.xlu0 %v2287_v29, %s2391_s4 }
0x16ad   :  { %v1479_v31 = vpop.permute.xlu1 %1478 }
0x16ae   :  { %v1481_v43 = vadd.f32 %v1479_v31, %v1471_v30 }
0x16b0   :  { %2288 = vtanh.f32 %v1481_v43 }
0x16bd   :  { %v2289_v7 = vpop.eup %2288 }
0x16be   :  { %1484 = vrot.lane.b32.xlu1 %v2289_v7, %s2391_s4 }
0x171a   :  { %v1413_v32 = vpop.permute.xlu0 %1412 }
0x171b   :  { %v1415_v33 = vmul.f32 %v2281_v19, %v1413_v32 }
0x171d   :  { %v1416_v34 = vpack.c.bf16 %v1415_v33, %v1415_v33 }
0x171f   :  { %1490 = vrot.lane.b32.xlu0 %v1416_v34, %s2402_s2 }
0x1730   :  { %v1485_v35 = vpop.permute.xlu1 %1484 }
0x1731   :  { %v1487_v36 = vmul.f32 %v2285_v23, %v1485_v35  ;;  %v1822_v23 = vld [vmem:[%s2921_s12] ss:$0 sm:$0xff] }
0x1733   :  { %v1488_v38 = vpack.c.bf16 %v1487_v36, %v1487_v36 }
0x1735   :  { %1493 = vrot.lane.b32.xlu1 %v1488_v38, %s2391_s4 }
0x1791   :  { %v1491_v56 = vpop.permute.xlu0 %1490 }
0x17a7   :  { %v1494_v37 = vpop.permute.xlu1 %1493 }
0x17a8   :  { %v1497_v39 = vsel %vm338_vm12, %v1491_v56, %v1494_v37 }
0x17a9   :  { %2104 = vmatmul.mubr.msk.bf16.vlgmr.msra.gmra.mxu1 %vm557_vm14, %v1497_v39 }
0x17aa   :  { %2123 = vmatprep.mubr.msk.bf16.mxu1 %vm2404_vm13, %v2403_v57  ;;  %2116 = vmatpush3.bf16.msra.mxu1 %v2166_v11 }
0x17ab   :  { %2117 = vmatprep.subr.bf16.mxu1 %v2403_v57 }
0x17ae   :  { %2118 = vmatpush3.bf16.msra.mxu1 %v2167_v12 }
0x17af   :  { %2119 = vmatprep.subr.bf16.mxu1 %v2403_v57 }
0x17b2   :  { %2120 = vmatpush3.bf16.msra.mxu1 %v2168_v21 }
0x17b3   :  { %2121 = vmatprep.subr.bf16.mxu1 %v2403_v57  ;;  %v1826_v57 = vld [vmem:[%s2923_s14] ss:$0 sm:$0xff] }
0x17b6   :  { %2122 = vmatpush3.bf16.msra.mxu1 %v2169_v22 }
0x1869   :  { %v1534_v58 = vpop.f32.mrf.mxu1 }
0x186a   :  { %v1535_v40 = vadd.f32 %v2628_v18, %v1534_v58 }
0x186b   :  { %v2105_v41 = vpop.f32.mrf.mxu1 }
0x186c   :  { %2290 = vtanh.f32 %v1535_v40  ;;  %v1821_v47 = vmul.f32 -1.442695, %v1535_v40 }
0x186d   :  { %v1537_v10 = vpop.f32.mrf.mxu1 }
0x186e   :  { %2292 = vpow2.f32 %v1821_v47 }
0x186f   :  { %v2106_v44 = vpop.f32.mrf.mxu1 }
0x1879   :  { %v2291_v45 = vpop.eup %2290 }
0x187a   :  { %1549 = vrot.lane.b32.xlu0 %v2291_v45, %s2391_s4 }
0x187b   :  { %v2293_v46 = vpop.eup %2292 }
0x187c   :  { %v1543_v48 = vadd.f32 1.0, %v2293_v46 }
0x187e   :  { %2294 = vrcp.f32 %v1543_v48 }
0x187f   :  { %2296 = vrsqrt.f32 %v1566_v50 }
0x188b   :  { %v2295_v51 = vpop.eup %2294 }
0x188c   :  { %v2297_v52 = vpop.eup %2296  ;;  %v1547_v0 = vmul.f32 %v2295_v51, %v1481_v43 }
0x188d   :  { %v1568_v8 = vmul.f32 %v2297_v52, %v1564_v54 }
0x188f   :  { %v1571_v1 = vmul.f32 %v1570_v63, %v1568_v8  ;;  %v1577_v61 = vrot.slane %v1568_v8, %v1576_v59 }
0x1891   :  { %v1572_v2 = vsub.f32 %v1569_v60, %v1571_v1 }
0x1893   :  { %v1586_v62 = vrot.slane %v1572_v2, %v1576_v59 }
0x18ec   :  { %v1550_v18 = vpop.permute.xlu0 %1549 }
0x18ed   :  { %v1552_v53 = vmul.f32 %v2295_v51, %v1550_v18 }
0x18ef   :  { %1554 = vrot.lane.b32.xlu1 %v1552_v53, %s2402_s2 }
0x18f3   :  { %1578 = vrot.lane.b32.xlu1 %v1577_v61, %s2405_s10 }
0x1961   :  { %v1555_v3 = vpop.permute.xlu1 %1554 }
0x1962   :  { %v1557_v4 = vadd.f32 %v1555_v3, %v1547_v0 }
0x1964   :  { %2298 = vtanh.f32 %v1557_v4 }
0x1965   :  { %v1579_v9 = vpop.permute.xlu1 %1578 }
0x1971   :  { %v2299_v5 = vpop.eup %2298 }
0x1972   :  { %1560 = vrot.lane.b32.xlu0 %v2299_v5, %s2391_s4 }
0x1976   :  { %1587 = vrot.lane.b32.xlu0 %v1586_v62, %s2405_s10 }
0x19e4   :  { %v1561_v14 = vpop.permute.xlu0 %1560 }
0x19e5   :  { %v1563_v15 = vmul.f32 %v2295_v51, %v1561_v14 }
0x19e7   :  { %v1581_v16 = vmul.f32 %v1579_v9, %v1563_v15 }
0x19e8   :  { %v1588_v17 = vpop.permute.xlu0 %1587 }
0x19e9   :  { %v1590_v19 = vadd.f32 %v1588_v17, %v1581_v16 }
0x19eb   :  { %v1591_v42 = vpack.c.bf16 %v1590_v19, %v1590_v19 }
0x19ed   :  { %1604 = vrot.lane.b32.xlu1 %v1591_v42, %s2402_s2 }
0x1a5f   :  { %v1605_v20 = vpop.permute.xlu1 %1604 }
0x1a60   :  { %2112 = vmatmul.mubr.msk.bf16.vlgmr.msra.gmra.mxu0 %vm338_vm12, %v1605_v20 }
0x1b20   :  { %v1655_v24 = vpop.f32.mrf.mxu0 }
0x1b21   :  { %v1656_v25 = vadd.f32 %v1822_v23, %v1655_v24 }
0x1b22   :  { %v2113_v26 = vpop.f32.mrf.mxu0 }
0x1b23   :  { %v1661_v27 = vmax.f32 %v1656_v25, 0.0 }
0x1b24   :  { %v1658_v28 = vpop.f32.mrf.mxu0 }
0x1b25   :  { %v1662_v29 = vpack.c.bf16 %v1661_v27, %v1661_v27 }
0x1b26   :  { %v2114_v30 = vpop.f32.mrf.mxu0 }
0x1b27   :  { %2124 = vmatmul.mubr.msk.bf16.vlgmr.msra.gmra.mxu1 %vm557_vm14, %v1662_v29 }
0x1be7   :  { %v1739_v31 = vpop.f32.mrf.mxu1 }
0x1be8   :  { %v1740_v43 = vadd.f32 %v1826_v57, %v1739_v31 }
0x1be9   :  { %v2125_v7 = vpop.f32.mrf.mxu1 }
0x1bea   :  { %1745 = vst [vmem:[%s2924_s15] sm:$0xff] %v1740_v43 }
0x1beb   :  { %v1742_v32 = vpop.f32.mrf.mxu1 }
0x1bed   :  { %v2126_v33 = vpop.f32.mrf.mxu1 }
0x1bee   :  { %1750 = vsyncpa [#allocation3], 1 }
0x1bef   :  { %1751 = vsyncpa [#allocation5], 1 }
0x1bf0   :  { %1752 = vsyncpa [#allocation8], 1 }

</bundles_post_ra>
